<compile_context>
chip_gen: v6e
topology: v6e:2x2x1
jax: 0.10.0
libtpu: 0.0.40
codegen_flags: <defaults>
</compile_context>

<pallas_src>
import math
import functools

import jax
import jax.numpy as jnp
from jax import lax
from jax.experimental import pallas as pl
from jax.experimental.pallas import tpu as pltpu


# ----------------------------------------------------------------------------
# Fused kernel: grid = (B // Bt, depth).  For each batch block, all `depth`
# encoder blocks run back-to-back with the activation resident in VMEM scratch.
# ----------------------------------------------------------------------------
def _encoder_kernel(x_ref,                                     # (Bt, S, D) f32
                    kbias_ref,                                 # (Bt, 1, S) f32 additive key mask
                    qmask_ref,                                 # (Bt, S, 1) f32 query-row mask
                    wqkv_ref, bqkv_ref, wo_ref, bo_ref,        # per-layer packed weights
                    w1_ref, b1_ref, w2_ref, b2_ref,
                    g1_ref, be1_ref, g2_ref, be2_ref,
                    out_ref,                                   # (Bt, S, D) f32
                    x_sc,                                      # VMEM (Bt*S, D) f32 scratch
                    *, heads, bt, seq):
    layer = pl.program_id(1)
    n_layers = pl.num_programs(1)
    R, D = x_sc.shape                              # R = Bt * S
    dh = D // heads
    BH = bt * heads
    bf16 = jnp.bfloat16

    @pl.when(layer == 0)
    def _():
        x_sc[...] = x_ref[...].reshape(R, D)

    x = x_sc[...]                                  # (R, D) f32, resident across layers

    # ---- fused QKV projection: (R, D) x (D, 3D) -> lane-dense (R, 3D) ----
    qkv = jnp.dot(x.astype(bf16), wqkv_ref[0],
                  preferred_element_type=jnp.float32) + bqkv_ref[0]

    def heads_minor(t):                            # (R, D) -> (Bt*heads, dh, S)
        t3 = jnp.transpose(t.reshape(bt, seq, D), (0, 2, 1))    # minor transpose
        return t3.reshape(BH, dh, seq)                          # sublane split

    # Only Q / V take the extra minor transpose; K stays in its natural (bh, dh, S)
    # layout so the score matmul is the canonical A @ B orientation.
    q3 = jnp.transpose(heads_minor(qkv[:, :D] * (1.0 / math.sqrt(dh))), (0, 2, 1))
    k3 = heads_minor(qkv[:, D:2 * D])                           # (BH, dh, S)
    v3 = jnp.transpose(heads_minor(qkv[:, 2 * D:]), (0, 2, 1))  # (BH, S, dh)

    # ---- batched multi-head attention (bf16 MXU operands, f32 softmax) ----
    s = jnp.einsum('bqd,bdk->bqk', q3.astype(bf16), k3.astype(bf16),
                   preferred_element_type=jnp.float32)          # (BH, S, S)
    s4 = s.reshape(bt, heads, seq, seq) + kbias_ref[...].reshape(bt, 1, 1, seq)
    s4 = s4 - jnp.max(s4, axis=-1, keepdims=True)
    p4 = jnp.exp(s4)
    p4 = p4 * pl.reciprocal(jnp.sum(p4, axis=-1, keepdims=True), approx=True)
    p = p4.reshape(BH, seq, seq)

    ctx = jnp.einsum('bqk,bkd->bqd', p.astype(bf16), v3.astype(bf16),
                     preferred_element_type=jnp.float32)        # (BH, S, dh)
    # (BH, S, dh) -> (R, D) with head-major lanes (matches merged w_o packing).
    ctx2d = jnp.transpose(jnp.transpose(ctx, (0, 2, 1)).reshape(bt, D, seq),
                          (0, 2, 1)).reshape(R, D)

    # ---- merged output projection: one (R, D) x (D, D) matmul ----
    att = jnp.dot(ctx2d.astype(bf16), wo_ref[0], preferred_element_type=jnp.float32)
    att = (att + bo_ref[0]) * qmask_ref[...].reshape(R, 1)      # zero padded query rows

    # ---- LayerNorm: unbiased std, eps added to std (matches the wrapper semantics).
    #      Exact division (no approx reciprocal) for numeric closeness to PyTorch. ----
    def layer_norm(y, gamma, beta, eps=1e-6):
        mean = jnp.mean(y, axis=-1, keepdims=True)
        var = jnp.sum((y - mean) ** 2, axis=-1, keepdims=True) * (1.0 / (D - 1))
        return gamma * (y - mean) / (jnp.sqrt(var) + eps) + beta

    h1 = layer_norm(x + att, g1_ref[0], be1_ref[0])

    # ---- MLP: Linear -> ReLU -> Linear (bf16 weights, f32 accumulation) ----
    m = jnp.dot(h1.astype(bf16), w1_ref[0], preferred_element_type=jnp.float32) + b1_ref[0]
    m = jnp.maximum(m, 0.0)
    m = jnp.dot(m.astype(bf16), w2_ref[0], preferred_element_type=jnp.float32) + b2_ref[0]

    y = layer_norm(h1 + m, g2_ref[0], be2_ref[0])

    @pl.when(layer < n_layers - 1)                 # skip the dead store on the last layer
    def _():
        x_sc[...] = y

    @pl.when(layer == n_layers - 1)
    def _():
        out_ref[...] = y.reshape(bt, seq, D).astype(out_ref.dtype)


# ----------------------------------------------------------------------------
# Wrapper: VMEM-budget-driven batch blocking + pallas_call plumbing.
# ----------------------------------------------------------------------------
def _vmem_limit_bytes():
    cap = 64 * 1024 * 1024                         # conservative default (v7x per-TC VMEM)
    try:
        cap = int(pltpu.get_tpu_info().vmem_capacity_bytes)
    except Exception:
        pass
    return min(int(cap * 0.75), 100 * 1024 * 1024)


def _pick_batch_tile(B, S, D, heads, budget):
    """Largest divisor of B whose per-step working set fits the VMEM budget."""
    best = 1
    weights = 2 * (12 * D * D * 2 + 16 * D * 4)    # double-buffered bf16 matrices + biases
    for bt in range(1, B + 1):
        if B % bt or bt * S > 4096:
            continue
        acts = 5 * bt * S * D * 4                  # x/out blocks (double-buffered) + scratch
        temps = (bt * S * 3 * D * 4                # qkv
                 + 2 * heads * bt * S * S * 4      # scores + probs
                 + 6 * bt * S * D * 4)             # q/k/v/ctx/att/mlp temporaries
        if weights + acts + temps <= budget:
            best = bt
    return best


def transformer_encoder_forward(x, lengths, stacked_params, heads):
    """x: (B, S, D) f32, lengths: (B,) int32, stacked_params: leading depth axis."""
    B, S, D = x.shape
    depth = stacked_params[0].shape[0]
    dh = D // heads
    assert D % heads == 0 and dh % 8 == 0, "head dim must be a multiple of 8"
    assert D % 128 == 0, "model dim must be lane-aligned (multiple of 128)"
    assert S % 8 == 0, "sequence length must be a multiple of 8"

    vmem_limit = _vmem_limit_bytes()
    bt = _pick_batch_tile(B, S, D, heads, budget=vmem_limit // 2)
    grid = (B // bt, depth)

    # Length-derived masks, built once in plain JAX (tiny inputs, no per-layer iotas).
    pos = jnp.arange(S, dtype=jnp.int32)
    valid = (pos[None, :] < lengths[:, None]).astype(jnp.float32)        # (B, S)
    kbias = ((valid - 1.0) * 1e30)[:, None, :]                           # (B, 1, S) 0 / -1e30
    qmask = valid[:, :, None]                                            # (B, S, 1)

    seq_specs = [
        pl.BlockSpec((bt, S, D), lambda bb, l: (bb, 0, 0)),              # x
        pl.BlockSpec((bt, 1, S), lambda bb, l: (bb, 0, 0)),              # kbias
        pl.BlockSpec((bt, S, 1), lambda bb, l: (bb, 0, 0)),              # qmask
    ]

    def layer_spec(p):
        nd = p.ndim
        return pl.BlockSpec((1,) + p.shape[1:],
                            lambda bb, l, _nd=nd: (l,) + (0,) * (_nd - 1))

    grid_spec = pltpu.PrefetchScalarGridSpec(
        num_scalar_prefetch=0,
        grid=grid,
        in_specs=seq_specs + [layer_spec(p) for p in stacked_params],
        out_specs=pl.BlockSpec((bt, S, D), lambda bb, l: (bb, 0, 0)),
        scratch_shapes=[pltpu.VMEM((bt * S, D), jnp.float32)],
    )
    return pl.pallas_call(
        functools.partial(_encoder_kernel, heads=heads, bt=bt, seq=S),
        out_shape=jax.ShapeDtypeStruct((B, S, D), x.dtype),
        grid_spec=grid_spec,
        compiler_params=pltpu.CompilerParams(
            dimension_semantics=("parallel", "arbitrary"),
            vmem_limit_bytes=vmem_limit,
        ),
    )(x, kbias, qmask, *stacked_params)


# ----------------------------------------------------------------------------
# Plain-JAX glue: positional embeddings + deterministic parameter construction.
# ----------------------------------------------------------------------------
def sinusoidal_pos_emb(lengths, max_len, D):
    """Sinusoidal positional embeddings; padded (end) positions get zero rows."""
    half = D // 2
    emb_scale = math.log(10000.0) / (half - 1)
    inv = jnp.exp(jnp.arange(half, dtype=jnp.float32) * -emb_scale)
    pos_idx = jnp.arange(max_len + 1, dtype=jnp.float32)[:, None]
    args = pos_idx * inv[None, :]
    table = jnp.concatenate([jnp.sin(args), jnp.cos(args)], axis=1)      # (max_len+1, D)
    table = table.at[0].set(0.0)                                         # padding row
    pos = jnp.arange(max_len, dtype=jnp.int32)[None, :]
    indices = jnp.where(pos < lengths[:, None], pos + 1, 0)              # (B, S)
    return table[indices]                                                # (B, S, D)


def init_block_params(key, D, heads):
    """Packed parameters for one encoder block (bf16 matrices, f32 biases / LN)."""
    ks = jax.random.split(key, 12)
    s = 1.0 / math.sqrt(D)
    u = lambda k, shape: jax.random.uniform(k, shape, jnp.float32, -s, s)

    # QKV packed column-wise as Wqkv^T: x @ w_qkv_t = [q | k | v], shape (D, 3D).
    wq, wk, wv = u(ks[0], (D, D)), u(ks[2], (D, D)), u(ks[4], (D, D))
    w_qkv_t = jnp.concatenate([wq.T, wk.T, wv.T], axis=1)                # (D, 3D)
    b_qkv = jnp.concatenate([u(ks[1], (1, D)), u(ks[3], (1, D)), u(ks[5], (1, D))],
                            axis=1)                                      # (1, 3D)
    # Merged output projection: att = ctx_flat(S, D) @ w_o (+ b_o), head-major lanes.
    w_o = u(ks[6], (D, D))
    b_o = u(ks[7], (1, D))
    w1 = u(ks[8], (D, D))
    b1 = u(ks[9], (1, D))
    w2 = u(ks[10], (D, D))
    b2 = u(ks[11], (1, D))
    g1 = jnp.ones((1, D), jnp.float32); be1 = jnp.zeros((1, D), jnp.float32)
    g2 = jnp.ones((1, D), jnp.float32); be2 = jnp.zeros((1, D), jnp.float32)
    bf = jnp.bfloat16
    return [w_qkv_t.astype(bf), b_qkv, w_o.astype(bf), b_o,
            w1.astype(bf), b1, w2.astype(bf), b2, g1, be1, g2, be2]


def transformer_encoder(x, lengths, stacked_params, heads, use_positional_embeddings=True):
    B, S, D = x.shape
    if use_positional_embeddings:
        x = x + sinusoidal_pos_emb(lengths, S, D)
    return transformer_encoder_forward(x, lengths, stacked_params, heads)


if __name__ == "__main__":
    B, S, D = 2, 16, 128
    heads, depth = 4, 2

    key = jax.random.PRNGKey(0)
    kx, kp = jax.random.split(key)
    x = jax.random.normal(kx, (B, S, D), jnp.float32)
    lengths = jnp.array([16, 11], dtype=jnp.int32)

    per_layer = [init_block_params(k, D, heads) for k in jax.random.split(kp, depth)]
    stacked_params = [jnp.stack([layer[i] for layer in per_layer], axis=0)
                      for i in range(len(per_layer[0]))]

    out = transformer_encoder(x, lengths, stacked_params, heads)
    out = jax.block_until_ready(out)
    assert out.shape == (B, S, D) and out.dtype == jnp.float32
    assert bool(jnp.all(jnp.isfinite(out)))
    print("KERNEL_OK")
</pallas_src>

<mosaic_0001>
module attributes {stable_mosaic.version = 11 : i64} {
  func.func @_encoder_kernel(%arg0: i32, %arg1: i32, %arg2: memref<2x16x128xf32, #tpu.memory_space<vmem>>, %arg3: memref<2x1x16xf32, #tpu.memory_space<vmem>>, %arg4: memref<2x16x1xf32, #tpu.memory_space<vmem>>, %arg5: memref<1x128x384xbf16, #tpu.memory_space<vmem>>, %arg6: memref<1x1x384xf32, #tpu.memory_space<vmem>>, %arg7: memref<1x128x128xbf16, #tpu.memory_space<vmem>>, %arg8: memref<1x1x128xf32, #tpu.memory_space<vmem>>, %arg9: memref<1x128x128xbf16, #tpu.memory_space<vmem>>, %arg10: memref<1x1x128xf32, #tpu.memory_space<vmem>>, %arg11: memref<1x128x128xbf16, #tpu.memory_space<vmem>>, %arg12: memref<1x1x128xf32, #tpu.memory_space<vmem>>, %arg13: memref<1x1x128xf32, #tpu.memory_space<vmem>>, %arg14: memref<1x1x128xf32, #tpu.memory_space<vmem>>, %arg15: memref<1x1x128xf32, #tpu.memory_space<vmem>>, %arg16: memref<1x1x128xf32, #tpu.memory_space<vmem>>, %arg17: memref<2x16x128xf32, #tpu.memory_space<vmem>>, %arg18: memref<32x128xf32, #tpu.memory_space<vmem>>) attributes {dimension_semantics = [#tpu.dimension_semantics<parallel>, #tpu.dimension_semantics<arbitrary>], iteration_bounds = array<i64: 1, 2>, scalar_prefetch = 0 : i64, scratch_operands = 1 : i64, tpu.core_type = #tpu.core_type<tc>, window_params = [{transform_indices = @transform_0, window_bounds = array<i64: 2, 16, 128>}, {transform_indices = @transform_1, window_bounds = array<i64: 2, 1, 16>}, {transform_indices = @transform_2, window_bounds = array<i64: 2, 16, 1>}, {transform_indices = @transform_3, window_bounds = array<i64: 1, 128, 384>}, {transform_indices = @transform_4, window_bounds = array<i64: 1, 1, 384>}, {transform_indices = @transform_5, window_bounds = array<i64: 1, 128, 128>}, {transform_indices = @transform_6, window_bounds = array<i64: 1, 1, 128>}, {transform_indices = @transform_7, window_bounds = array<i64: 1, 128, 128>}, {transform_indices = @transform_8, window_bounds = array<i64: 1, 1, 128>}, {transform_indices = @transform_9, window_bounds = array<i64: 1, 128, 128>}, {transform_indices = @transform_10, window_bounds = array<i64: 1, 1, 128>}, {transform_indices = @transform_11, window_bounds = array<i64: 1, 1, 128>}, {transform_indices = @transform_12, window_bounds = array<i64: 1, 1, 128>}, {transform_indices = @transform_13, window_bounds = array<i64: 1, 1, 128>}, {transform_indices = @transform_14, window_bounds = array<i64: 1, 1, 128>}, {transform_indices = @transform_15, window_bounds = array<i64: 2, 16, 128>}]} {
    %c0_i32 = arith.constant 0 : i32
    %0 = arith.cmpi eq, %arg1, %c0_i32 : i32
    %1 = arith.extui %0 : i1 to i32
    %c0_i32_0 = arith.constant 0 : i32
    %2 = arith.cmpi ne, %1, %c0_i32_0 : i32
    scf.if %2 {
      %c0_66 = arith.constant 0 : index
      %c0_67 = arith.constant 0 : index
      %c0_68 = arith.constant 0 : index
      %144 = vector.load %arg2[%c0_66, %c0_67, %c0_68] : memref<2x16x128xf32, #tpu.memory_space<vmem>>, vector<2x16x128xf32>
      %145 = vector.shape_cast %144 : vector<2x16x128xf32> to vector<32x128xf32>
      %c0_69 = arith.constant 0 : index
      %c0_70 = arith.constant 0 : index
      %146 = vector.load %arg18[%c0_69, %c0_70] : memref<32x128xf32, #tpu.memory_space<vmem>>, vector<32x128xf32>
      tpu.vector_store %arg18[%c0_69, %c0_70], %145 {strides = array<i32>} : memref<32x128xf32, #tpu.memory_space<vmem>>, vector<32x128xf32>,
    } else {
    }
    %c0 = arith.constant 0 : index
    %c0_1 = arith.constant 0 : index
    %3 = vector.load %arg18[%c0, %c0_1] : memref<32x128xf32, #tpu.memory_space<vmem>>, vector<32x128xf32>
    %4 = arith.truncf %3 : vector<32x128xf32> to vector<32x128xbf16>
    %c0_2 = arith.constant 0 : index
    %c0_3 = arith.constant 0 : index
    %c0_4 = arith.constant 0 : index
    %5 = vector.load %arg5[%c0_2, %c0_3, %c0_4] : memref<1x128x384xbf16, #tpu.memory_space<vmem>>, vector<1x128x384xbf16>
    %6 = vector.shape_cast %5 : vector<1x128x384xbf16> to vector<128x384xbf16>
    %cst = arith.constant dense<0.000000e+00> : vector<32x384xf32>
    %7 = tpu.matmul %4, %6, %cst {dimension_numbers = #tpu.dot_dimension_numbers<[1], [0], [0], [1], [0, 0, 1, 1], [], []>} : vector<32x128xbf16>, vector<128x384xbf16>, vector<32x384xf32> -> vector<32x384xf32>
    %c0_5 = arith.constant 0 : index
    %c0_6 = arith.constant 0 : index
    %c0_7 = arith.constant 0 : index
    %8 = vector.load %arg6[%c0_5, %c0_6, %c0_7] : memref<1x1x384xf32, #tpu.memory_space<vmem>>, vector<1x1x384xf32>
    %9 = vector.shape_cast %8 : vector<1x1x384xf32> to vector<1x384xf32>
    %10 = vector.broadcast %9 : vector<1x384xf32> to vector<32x384xf32>
    %11 = arith.addf %7, %10 : vector<32x384xf32>
    %12 = vector.extract_strided_slice %11 {offsets = [0, 0], sizes = [32, 128], strides = [1, 1]} : vector<32x384xf32> to vector<32x128xf32>
    %cst_8 = arith.constant 0.176776692 : f32
    %13 = vector.broadcast %cst_8 : f32 to vector<32x128xf32>
    %14 = arith.mulf %12, %13 : vector<32x128xf32>
    %15 = vector.shape_cast %14 : vector<32x128xf32> to vector<2x16x128xf32>
    %16 = tpu.transpose %15, [0, 2, 1] : vector<2x16x128xf32> -> vector<2x128x16xf32>
    %17 = vector.shape_cast %16 : vector<2x128x16xf32> to vector<8x32x16xf32>
    %18 = tpu.transpose %17, [0, 2, 1] : vector<8x32x16xf32> -> vector<8x16x32xf32>
    %19 = vector.extract_strided_slice %11 {offsets = [0, 128], sizes = [32, 128], strides = [1, 1]} : vector<32x384xf32> to vector<32x128xf32>
    %20 = vector.shape_cast %19 : vector<32x128xf32> to vector<2x16x128xf32>
    %21 = tpu.transpose %20, [0, 2, 1] : vector<2x16x128xf32> -> vector<2x128x16xf32>
    %22 = vector.shape_cast %21 : vector<2x128x16xf32> to vector<8x32x16xf32>
    %23 = vector.extract_strided_slice %11 {offsets = [0, 256], sizes = [32, 128], strides = [1, 1]} : vector<32x384xf32> to vector<32x128xf32>
    %24 = vector.shape_cast %23 : vector<32x128xf32> to vector<2x16x128xf32>
    %25 = tpu.transpose %24, [0, 2, 1] : vector<2x16x128xf32> -> vector<2x128x16xf32>
    %26 = vector.shape_cast %25 : vector<2x128x16xf32> to vector<8x32x16xf32>
    %27 = tpu.transpose %26, [0, 2, 1] : vector<8x32x16xf32> -> vector<8x16x32xf32>
    %28 = arith.truncf %18 : vector<8x16x32xf32> to vector<8x16x32xbf16>
    %29 = arith.truncf %22 : vector<8x32x16xf32> to vector<8x32x16xbf16>
    "tpu.trace_start"() <{level = 10 : i32, message = "bqd,bdk->bqk"}> : () -> ()
    %cst_9 = arith.constant dense<0.000000e+00> : vector<8x16x16xf32>
    %30 = tpu.matmul %28, %29, %cst_9 {dimension_numbers = #tpu.dot_dimension_numbers<[2], [1], [1], [2], [0, 0, 0, 1, 1, 2], [0], [0]>} : vector<8x16x32xbf16>, vector<8x32x16xbf16>, vector<8x16x16xf32> -> vector<8x16x16xf32>
    "tpu.trace_stop"() : () -> ()
    %31 = vector.shape_cast %30 : vector<8x16x16xf32> to vector<2x4x16x16xf32>
    %c0_10 = arith.constant 0 : index
    %c0_11 = arith.constant 0 : index
    %c0_12 = arith.constant 0 : index
    %32 = vector.load %arg3[%c0_10, %c0_11, %c0_12] : memref<2x1x16xf32, #tpu.memory_space<vmem>>, vector<2x1x16xf32>
    %33 = vector.shape_cast %32 : vector<2x1x16xf32> to vector<2x1x1x16xf32>
    %34 = vector.broadcast %33 : vector<2x1x1x16xf32> to vector<2x4x16x16xf32>
    %35 = arith.addf %31, %34 : vector<2x4x16x16xf32>
    %cst_13 = arith.constant dense<0xFF800000> : vector<2x4x16xf32>
    %36 = vector.multi_reduction <maximumf>, %35, %cst_13 [3] : vector<2x4x16x16xf32> to vector<2x4x16xf32>
    %37 = vector.shape_cast %36 : vector<2x4x16xf32> to vector<2x4x16x1xf32>
    %38 = vector.broadcast %37 : vector<2x4x16x1xf32> to vector<2x4x16x16xf32>
    %39 = arith.subf %35, %38 : vector<2x4x16x16xf32>
    %40 = math.exp %39 : vector<2x4x16x16xf32>
    %cst_14 = arith.constant dense<0.000000e+00> : vector<2x4x16xf32>
    %41 = vector.multi_reduction <add>, %40, %cst_14 [3] : vector<2x4x16x16xf32> to vector<2x4x16xf32>
    %42 = vector.shape_cast %41 : vector<2x4x16xf32> to vector<2x4x16x1xf32>
    %43 = tpu.reciprocal %42 {approx = true} : vector<2x4x16x1xf32> -> vector<2x4x16x1xf32>
    %44 = vector.broadcast %43 : vector<2x4x16x1xf32> to vector<2x4x16x16xf32>
    %45 = arith.mulf %40, %44 : vector<2x4x16x16xf32>
    %46 = vector.shape_cast %45 : vector<2x4x16x16xf32> to vector<8x16x16xf32>
    %47 = arith.truncf %46 : vector<8x16x16xf32> to vector<8x16x16xbf16>
    %48 = arith.truncf %27 : vector<8x16x32xf32> to vector<8x16x32xbf16>
    "tpu.trace_start"() <{level = 10 : i32, message = "bqk,bkd->bqd"}> : () -> ()
    %cst_15 = arith.constant dense<0.000000e+00> : vector<8x16x32xf32>
    %49 = tpu.matmul %47, %48, %cst_15 {dimension_numbers = #tpu.dot_dimension_numbers<[2], [1], [1], [2], [0, 0, 0, 1, 1, 2], [0], [0]>} : vector<8x16x16xbf16>, vector<8x16x32xbf16>, vector<8x16x32xf32> -> vector<8x16x32xf32>
    "tpu.trace_stop"() : () -> ()
    %50 = tpu.transpose %49, [0, 2, 1] : vector<8x16x32xf32> -> vector<8x32x16xf32>
    %51 = vector.shape_cast %50 : vector<8x32x16xf32> to vector<2x128x16xf32>
    %52 = tpu.transpose %51, [0, 2, 1] : vector<2x128x16xf32> -> vector<2x16x128xf32>
    %53 = vector.shape_cast %52 : vector<2x16x128xf32> to vector<32x128xf32>
    %54 = arith.truncf %53 : vector<32x128xf32> to vector<32x128xbf16>
    %c0_16 = arith.constant 0 : index
    %c0_17 = arith.constant 0 : index
    %c0_18 = arith.constant 0 : index
    %55 = vector.load %arg7[%c0_16, %c0_17, %c0_18] : memref<1x128x128xbf16, #tpu.memory_space<vmem>>, vector<1x128x128xbf16>
    %56 = vector.shape_cast %55 : vector<1x128x128xbf16> to vector<128x128xbf16>
    %cst_19 = arith.constant dense<0.000000e+00> : vector<32x128xf32>
    %57 = tpu.matmul %54, %56, %cst_19 {dimension_numbers = #tpu.dot_dimension_numbers<[1], [0], [0], [1], [0, 0, 1, 1], [], []>} : vector<32x128xbf16>, vector<128x128xbf16>, vector<32x128xf32> -> vector<32x128xf32>
    %c0_20 = arith.constant 0 : index
    %c0_21 = arith.constant 0 : index
    %c0_22 = arith.constant 0 : index
    %58 = vector.load %arg8[%c0_20, %c0_21, %c0_22] : memref<1x1x128xf32, #tpu.memory_space<vmem>>, vector<1x1x128xf32>
    %59 = vector.shape_cast %58 : vector<1x1x128xf32> to vector<1x128xf32>
    %60 = vector.broadcast %59 : vector<1x128xf32> to vector<32x128xf32>
    %61 = arith.addf %57, %60 : vector<32x128xf32>
    %c0_23 = arith.constant 0 : index
    %c0_24 = arith.constant 0 : index
    %c0_25 = arith.constant 0 : index
    %62 = vector.load %arg4[%c0_23, %c0_24, %c0_25] : memref<2x16x1xf32, #tpu.memory_space<vmem>>, vector<2x16x1xf32>
    %63 = vector.shape_cast %62 : vector<2x16x1xf32> to vector<32x1xf32>
    %64 = vector.broadcast %63 : vector<32x1xf32> to vector<32x128xf32>
    %65 = arith.mulf %61, %64 : vector<32x128xf32>
    %66 = arith.addf %3, %65 : vector<32x128xf32>
    %c0_26 = arith.constant 0 : index
    %c0_27 = arith.constant 0 : index
    %c0_28 = arith.constant 0 : index
    %67 = vector.load %arg13[%c0_26, %c0_27, %c0_28] : memref<1x1x128xf32, #tpu.memory_space<vmem>>, vector<1x1x128xf32>
    %68 = vector.shape_cast %67 : vector<1x1x128xf32> to vector<1x128xf32>
    %c0_29 = arith.constant 0 : index
    %c0_30 = arith.constant 0 : index
    %c0_31 = arith.constant 0 : index
    %69 = vector.load %arg14[%c0_29, %c0_30, %c0_31] : memref<1x1x128xf32, #tpu.memory_space<vmem>>, vector<1x1x128xf32>
    %70 = vector.shape_cast %69 : vector<1x1x128xf32> to vector<1x128xf32>
    %cst_32 = arith.constant dense<0.000000e+00> : vector<32xf32>
    %71 = vector.multi_reduction <add>, %66, %cst_32 [1] : vector<32x128xf32> to vector<32xf32>
    %72 = vector.shape_cast %71 : vector<32xf32> to vector<32x1xf32>
    %cst_33 = arith.constant 1.280000e+02 : f32
    %73 = vector.broadcast %cst_33 : f32 to vector<32x1xf32>
    %74 = arith.divf %72, %73 : vector<32x1xf32>
    %75 = vector.broadcast %74 : vector<32x1xf32> to vector<32x128xf32>
    %76 = arith.subf %66, %75 : vector<32x128xf32>
    %77 = arith.mulf %76, %76 : vector<32x128xf32>
    %cst_34 = arith.constant dense<0.000000e+00> : vector<32xf32>
    %78 = vector.multi_reduction <add>, %77, %cst_34 [1] : vector<32x128xf32> to vector<32xf32>
    %79 = vector.shape_cast %78 : vector<32xf32> to vector<32x1xf32>
    %cst_35 = arith.constant 0.00787401571 : f32
    %80 = vector.broadcast %cst_35 : f32 to vector<32x1xf32>
    %81 = arith.mulf %79, %80 : vector<32x1xf32>
    %82 = vector.broadcast %74 : vector<32x1xf32> to vector<32x128xf32>
    %83 = arith.subf %66, %82 : vector<32x128xf32>
    %84 = vector.broadcast %68 : vector<1x128xf32> to vector<32x128xf32>
    %85 = arith.mulf %84, %83 : vector<32x128xf32>
    %86 = math.sqrt %81 : vector<32x1xf32>
    %cst_36 = arith.constant 9.99999997E-7 : f32
    %87 = vector.broadcast %cst_36 : f32 to vector<32x1xf32>
    %88 = arith.addf %86, %87 : vector<32x1xf32>
    %89 = vector.broadcast %88 : vector<32x1xf32> to vector<32x128xf32>
    %90 = arith.divf %85, %89 : vector<32x128xf32>
    %91 = vector.broadcast %70 : vector<1x128xf32> to vector<32x128xf32>
    %92 = arith.addf %90, %91 : vector<32x128xf32>
    %93 = arith.truncf %92 : vector<32x128xf32> to vector<32x128xbf16>
    %c0_37 = arith.constant 0 : index
    %c0_38 = arith.constant 0 : index
    %c0_39 = arith.constant 0 : index
    %94 = vector.load %arg9[%c0_37, %c0_38, %c0_39] : memref<1x128x128xbf16, #tpu.memory_space<vmem>>, vector<1x128x128xbf16>
    %95 = vector.shape_cast %94 : vector<1x128x128xbf16> to vector<128x128xbf16>
    %cst_40 = arith.constant dense<0.000000e+00> : vector<32x128xf32>
    %96 = tpu.matmul %93, %95, %cst_40 {dimension_numbers = #tpu.dot_dimension_numbers<[1], [0], [0], [1], [0, 0, 1, 1], [], []>} : vector<32x128xbf16>, vector<128x128xbf16>, vector<32x128xf32> -> vector<32x128xf32>
    %c0_41 = arith.constant 0 : index
    %c0_42 = arith.constant 0 : index
    %c0_43 = arith.constant 0 : index
    %97 = vector.load %arg10[%c0_41, %c0_42, %c0_43] : memref<1x1x128xf32, #tpu.memory_space<vmem>>, vector<1x1x128xf32>
    %98 = vector.shape_cast %97 : vector<1x1x128xf32> to vector<1x128xf32>
    %99 = vector.broadcast %98 : vector<1x128xf32> to vector<32x128xf32>
    %100 = arith.addf %96, %99 : vector<32x128xf32>
    %cst_44 = arith.constant 0.000000e+00 : f32
    %101 = vector.broadcast %cst_44 : f32 to vector<32x128xf32>
    %102 = arith.maximumf %100, %101 : vector<32x128xf32>
    %103 = arith.truncf %102 : vector<32x128xf32> to vector<32x128xbf16>
    %c0_45 = arith.constant 0 : index
    %c0_46 = arith.constant 0 : index
    %c0_47 = arith.constant 0 : index
    %104 = vector.load %arg11[%c0_45, %c0_46, %c0_47] : memref<1x128x128xbf16, #tpu.memory_space<vmem>>, vector<1x128x128xbf16>
    %105 = vector.shape_cast %104 : vector<1x128x128xbf16> to vector<128x128xbf16>
    %cst_48 = arith.constant dense<0.000000e+00> : vector<32x128xf32>
    %106 = tpu.matmul %103, %105, %cst_48 {dimension_numbers = #tpu.dot_dimension_numbers<[1], [0], [0], [1], [0, 0, 1, 1], [], []>} : vector<32x128xbf16>, vector<128x128xbf16>, vector<32x128xf32> -> vector<32x128xf32>
    %c0_49 = arith.constant 0 : index
    %c0_50 = arith.constant 0 : index
    %c0_51 = arith.constant 0 : index
    %107 = vector.load %arg12[%c0_49, %c0_50, %c0_51] : memref<1x1x128xf32, #tpu.memory_space<vmem>>, vector<1x1x128xf32>
    %108 = vector.shape_cast %107 : vector<1x1x128xf32> to vector<1x128xf32>
    %109 = vector.broadcast %108 : vector<1x128xf32> to vector<32x128xf32>
    %110 = arith.addf %106, %109 : vector<32x128xf32>
    %111 = arith.addf %92, %110 : vector<32x128xf32>
    %c0_52 = arith.constant 0 : index
    %c0_53 = arith.constant 0 : index
    %c0_54 = arith.constant 0 : index
    %112 = vector.load %arg15[%c0_52, %c0_53, %c0_54] : memref<1x1x128xf32, #tpu.memory_space<vmem>>, vector<1x1x128xf32>
    %113 = vector.shape_cast %112 : vector<1x1x128xf32> to vector<1x128xf32>
    %c0_55 = arith.constant 0 : index
    %c0_56 = arith.constant 0 : index
    %c0_57 = arith.constant 0 : index
    %114 = vector.load %arg16[%c0_55, %c0_56, %c0_57] : memref<1x1x128xf32, #tpu.memory_space<vmem>>, vector<1x1x128xf32>
    %115 = vector.shape_cast %114 : vector<1x1x128xf32> to vector<1x128xf32>
    %cst_58 = arith.constant dense<0.000000e+00> : vector<32xf32>
    %116 = vector.multi_reduction <add>, %111, %cst_58 [1] : vector<32x128xf32> to vector<32xf32>
    %117 = vector.shape_cast %116 : vector<32xf32> to vector<32x1xf32>
    %cst_59 = arith.constant 1.280000e+02 : f32
    %118 = vector.broadcast %cst_59 : f32 to vector<32x1xf32>
    %119 = arith.divf %117, %118 : vector<32x1xf32>
    %120 = vector.broadcast %119 : vector<32x1xf32> to vector<32x128xf32>
    %121 = arith.subf %111, %120 : vector<32x128xf32>
    %122 = arith.mulf %121, %121 : vector<32x128xf32>
    %cst_60 = arith.constant dense<0.000000e+00> : vector<32xf32>
    %123 = vector.multi_reduction <add>, %122, %cst_60 [1] : vector<32x128xf32> to vector<32xf32>
    %124 = vector.shape_cast %123 : vector<32xf32> to vector<32x1xf32>
    %cst_61 = arith.constant 0.00787401571 : f32
    %125 = vector.broadcast %cst_61 : f32 to vector<32x1xf32>
    %126 = arith.mulf %124, %125 : vector<32x1xf32>
    %127 = vector.broadcast %119 : vector<32x1xf32> to vector<32x128xf32>
    %128 = arith.subf %111, %127 : vector<32x128xf32>
    %129 = vector.broadcast %113 : vector<1x128xf32> to vector<32x128xf32>
    %130 = arith.mulf %129, %128 : vector<32x128xf32>
    %131 = math.sqrt %126 : vector<32x1xf32>
    %cst_62 = arith.constant 9.99999997E-7 : f32
    %132 = vector.broadcast %cst_62 : f32 to vector<32x1xf32>
    %133 = arith.addf %131, %132 : vector<32x1xf32>
    %134 = vector.broadcast %133 : vector<32x1xf32> to vector<32x128xf32>
    %135 = arith.divf %130, %134 : vector<32x128xf32>
    %136 = vector.broadcast %115 : vector<1x128xf32> to vector<32x128xf32>
    %137 = arith.addf %135, %136 : vector<32x128xf32>
    %c1_i32 = arith.constant 1 : i32
    %138 = arith.cmpi slt, %arg1, %c1_i32 : i32
    %139 = arith.extui %138 : i1 to i32
    %c0_i32_63 = arith.constant 0 : i32
    %140 = arith.cmpi ne, %139, %c0_i32_63 : i32
    scf.if %140 {
      %c0_66 = arith.constant 0 : index
      %c0_67 = arith.constant 0 : index
      %144 = vector.load %arg18[%c0_66, %c0_67] : memref<32x128xf32, #tpu.memory_space<vmem>>, vector<32x128xf32>
      tpu.vector_store %arg18[%c0_66, %c0_67], %137 {strides = array<i32>} : memref<32x128xf32, #tpu.memory_space<vmem>>, vector<32x128xf32>,
    } else {
    }
    %c1_i32_64 = arith.constant 1 : i32
    %141 = arith.cmpi eq, %arg1, %c1_i32_64 : i32
    %142 = arith.extui %141 : i1 to i32
    %c0_i32_65 = arith.constant 0 : i32
    %143 = arith.cmpi ne, %142, %c0_i32_65 : i32
    scf.if %143 {
      %144 = vector.shape_cast %137 : vector<32x128xf32> to vector<2x16x128xf32>
      %c0_66 = arith.constant 0 : index
      %c0_67 = arith.constant 0 : index
      %c0_68 = arith.constant 0 : index
      %145 = vector.load %arg17[%c0_66, %c0_67, %c0_68] : memref<2x16x128xf32, #tpu.memory_space<vmem>>, vector<2x16x128xf32>
      tpu.vector_store %arg17[%c0_66, %c0_67, %c0_68], %144 {strides = array<i32>} : memref<2x16x128xf32, #tpu.memory_space<vmem>>, vector<2x16x128xf32>,
    } else {
    }
    return
  }
  func.func @transform_0(%arg0: i32, %arg1: i32) -> (i32, i32, i32) {
    %c0_i32 = arith.constant 0 : i32
    %c0_i32_0 = arith.constant 0 : i32
    %c0_i32_1 = arith.constant 0 : i32
    return %arg0, %c0_i32, %c0_i32_0 : i32, i32, i32
  }
  func.func @transform_1(%arg0: i32, %arg1: i32) -> (i32, i32, i32) {
    %c0_i32 = arith.constant 0 : i32
    %c0_i32_0 = arith.constant 0 : i32
    %c0_i32_1 = arith.constant 0 : i32
    return %arg0, %c0_i32, %c0_i32_0 : i32, i32, i32
  }
  func.func @transform_2(%arg0: i32, %arg1: i32) -> (i32, i32, i32) {
    %c0_i32 = arith.constant 0 : i32
    %c0_i32_0 = arith.constant 0 : i32
    %c0_i32_1 = arith.constant 0 : i32
    return %arg0, %c0_i32, %c0_i32_0 : i32, i32, i32
  }
  func.func @transform_3(%arg0: i32, %arg1: i32) -> (i32, i32, i32) {
    %c0_i32 = arith.constant 0 : i32
    %c0_i32_0 = arith.constant 0 : i32
    %c0_i32_1 = arith.constant 0 : i32
    return %arg1, %c0_i32, %c0_i32_0 : i32, i32, i32
  }
  func.func @transform_4(%arg0: i32, %arg1: i32) -> (i32, i32, i32) {
    %c0_i32 = arith.constant 0 : i32
    %c0_i32_0 = arith.constant 0 : i32
    %c0_i32_1 = arith.constant 0 : i32
    return %arg1, %c0_i32, %c0_i32_0 : i32, i32, i32
  }
  func.func @transform_5(%arg0: i32, %arg1: i32) -> (i32, i32, i32) {
    %c0_i32 = arith.constant 0 : i32
    %c0_i32_0 = arith.constant 0 : i32
    %c0_i32_1 = arith.constant 0 : i32
    return %arg1, %c0_i32, %c0_i32_0 : i32, i32, i32
  }
  func.func @transform_6(%arg0: i32, %arg1: i32) -> (i32, i32, i32) {
    %c0_i32 = arith.constant 0 : i32
    %c0_i32_0 = arith.constant 0 : i32
    %c0_i32_1 = arith.constant 0 : i32
    return %arg1, %c0_i32, %c0_i32_0 : i32, i32, i32
  }
  func.func @transform_7(%arg0: i32, %arg1: i32) -> (i32, i32, i32) {
    %c0_i32 = arith.constant 0 : i32
    %c0_i32_0 = arith.constant 0 : i32
    %c0_i32_1 = arith.constant 0 : i32
    return %arg1, %c0_i32, %c0_i32_0 : i32, i32, i32
  }
  func.func @transform_8(%arg0: i32, %arg1: i32) -> (i32, i32, i32) {
    %c0_i32 = arith.constant 0 : i32
    %c0_i32_0 = arith.constant 0 : i32
    %c0_i32_1 = arith.constant 0 : i32
    return %arg1, %c0_i32, %c0_i32_0 : i32, i32, i32
  }
  func.func @transform_9(%arg0: i32, %arg1: i32) -> (i32, i32, i32) {
    %c0_i32 = arith.constant 0 : i32
    %c0_i32_0 = arith.constant 0 : i32
    %c0_i32_1 = arith.constant 0 : i32
    return %arg1, %c0_i32, %c0_i32_0 : i32, i32, i32
  }
  func.func @transform_10(%arg0: i32, %arg1: i32) -> (i32, i32, i32) {
    %c0_i32 = arith.constant 0 : i32
    %c0_i32_0 = arith.constant 0 : i32
    %c0_i32_1 = arith.constant 0 : i32
    return %arg1, %c0_i32, %c0_i32_0 : i32, i32, i32
  }
  func.func @transform_11(%arg0: i32, %arg1: i32) -> (i32, i32, i32) {
    %c0_i32 = arith.constant 0 : i32
    %c0_i32_0 = arith.constant 0 : i32
    %c0_i32_1 = arith.constant 0 : i32
    return %arg1, %c0_i32, %c0_i32_0 : i32, i32, i32
  }
  func.func @transform_12(%arg0: i32, %arg1: i32) -> (i32, i32, i32) {
    %c0_i32 = arith.constant 0 : i32
    %c0_i32_0 = arith.constant 0 : i32
    %c0_i32_1 = arith.constant 0 : i32
    return %arg1, %c0_i32, %c0_i32_0 : i32, i32, i32
  }
  func.func @transform_13(%arg0: i32, %arg1: i32) -> (i32, i32, i32) {
    %c0_i32 = arith.constant 0 : i32
    %c0_i32_0 = arith.constant 0 : i32
    %c0_i32_1 = arith.constant 0 : i32
    return %arg1, %c0_i32, %c0_i32_0 : i32, i32, i32
  }
  func.func @transform_14(%arg0: i32, %arg1: i32) -> (i32, i32, i32) {
    %c0_i32 = arith.constant 0 : i32
    %c0_i32_0 = arith.constant 0 : i32
    %c0_i32_1 = arith.constant 0 : i32
    return %arg1, %c0_i32, %c0_i32_0 : i32, i32, i32
  }
  func.func @transform_15(%arg0: i32, %arg1: i32) -> (i32, i32, i32) {
    %c0_i32 = arith.constant 0 : i32
    %c0_i32_0 = arith.constant 0 : i32
    %c0_i32_1 = arith.constant 0 : i32
    return %arg0, %c0_i32, %c0_i32_0 : i32, i32, i32
  }
}

</mosaic_0001>

<bundles_post_ra>
// kernel: tpu_custom_call.1
= control target key start
LH: loop header
LB: loop body
LE: loop exit
PB: predicated region body
PF: predicated region fallthrough
CT: control target
= control target key end

     0   :  { %s6201_s0 = inlined_call_operand.vmem [shape: f32[2,16,128], index: 0, kind: input, shape index: {}]   ;;  %s6202_s1 = inlined_call_operand.hbm [shape: f32[2,1,16], index: 1, kind: input, shape index: {}]   ;;  %s6203_s2 = inlined_call_operand.vmem [shape: f32[2,16,1], index: 2, kind: input, shape index: {}]   ;;  %s6204_s3 = inlined_call_operand.hbm [shape: bf16[2,128,384], index: 3, kind: input, shape index: {}]   ;;  %s6205_s4 = inlined_call_operand.vmem [shape: f32[2,1,384], index: 4, kind: input, shape index: {}]   ;;  %s6206_s5 = inlined_call_operand.hbm [shape: bf16[2,128,128], index: 5, kind: input, shape index: {}]   ;;  %s6207_s6 = inlined_call_operand.vmem [shape: f32[2,1,128], index: 6, kind: input, shape index: {}]   ;;  %s6208_s7 = inlined_call_operand.hbm [shape: bf16[2,128,128], index: 7, kind: input, shape index: {}]   ;;  %s6209_s8 = inlined_call_operand.vmem [shape: f32[2,1,128], index: 8, kind: input, shape index: {}]   ;;  %s6210_s9 = inlined_call_operand.hbm [shape: bf16[2,128,128], index: 9, kind: input, shape index: {}]   ;;  %s6211_s10 = inlined_call_operand.vmem [shape: f32[2,1,128], index: 10, kind: input, shape index: {}]   ;;  %s6212_s11 = inlined_call_operand.vmem [shape: f32[2,1,128], index: 11, kind: input, shape index: {}]   ;;  %s6213_s12 = inlined_call_operand.vmem [shape: f32[2,1,128], index: 12, kind: input, shape index: {}]   ;;  %s6214_s13 = inlined_call_operand.vmem [shape: f32[2,1,128], index: 13, kind: input, shape index: {}]   ;;  %s6215_s14 = inlined_call_operand.vmem [shape: f32[2,1,128], index: 14, kind: input, shape index: {}]   ;;  %s6216_s15 = inlined_call_operand.hbm [shape: f32[2,16,128], index: 15, kind: output, shape index: {}]  }
   0x1   :  { %6230 = sst [smem:[#allocation24_spill]] %s6201_s0 }
   0x2   :  { %6231 = sst [smem:[#allocation25_spill]] %s6202_s1 }
   0x3   :  { %6232 = sst [smem:[#allocation26_spill]] %s6203_s2 }
   0x4   :  { %6233 = sst [smem:[#allocation27_spill]] %s6204_s3 }
   0x5   :  { %6234 = sst [smem:[#allocation28_spill]] %s6206_s5 }
   0x6   :  { %6235 = sst [smem:[#allocation29_spill]] %s6208_s7 }
   0x7   :  { %6236 = sst [smem:[#allocation30_spill]] %s6210_s9 }
   0x8   :  { %6237 = sst [smem:[#allocation31_spill]] %s6214_s13 }
   0x9   :  { %6238 = sst [smem:[#allocation32_spill]] %s6215_s14 }
   0xa   :  { %6239 = sst [smem:[#allocation33_spill]] %s6216_s15 }
   0xb   :  { %20 = vsyncpa [#allocation4], 0 }
   0xc   :  { %21 = vsyncpa [#allocation7], 0 }
   0xd   :  { %23 = vsyncpa [#allocation7 + $0x1], 0 }
   0xe   :  { %24 = vsyncpa [#allocation10], 0 }
   0xf   :  { %26 = vsyncpa [#allocation10 + $0x1], 0 }
  0x10   :  { %27 = vsyncpa [#allocation5], 0  ;;  %s5389_s18 = smov 0   ;;  %s5391_s19 = smov 0  }
  0x11   :  { %s5393_s20 = smov 0   ;;  %s5395_s21 = smov 0  }
  0x12   :  { %s5397_s22 = smov 0   ;;  %s5399_s23 = smov 0  }
  0x13 LB: > { %6240 = sst [smem:[#allocation17_spill]] %s5274_s19  ;;  %s42_s24 = sadd.s32 1, %s5286_s22  ;;  %s5290_s23 = sphi %s5399_s23, %s33_s23   ;;  %s5286_s22 = sphi %s5397_s22, %s6278_s22   ;;  %s5282_s21 = sphi %s5395_s21, %s6277_s21   ;;  %s5278_s20 = sphi %s5393_s20, %s6276_s20   ;;  %s5274_s19 = sphi %s5391_s19, %s6275_s19   ;;  %s5270_s18 = sphi %s5389_s18, %s6274_s18  }
  0x14   : > { %6241 = sst [smem:[#allocation18_spill]] %s5278_s20  ;;  %s130_s25 = sadd.s32 1, %s5278_s20 }
  0x15   : > { %6242 = sst [smem:[#allocation19_spill]] %s5286_s22  ;;  %p43_p0 = scmp.ge.s32.totalorder %s42_s24, 2 }
  0x16   : > { %6243 = sst [smem:[#allocation20_spill]] %s5290_s23  ;;  %p137_p1 = scmp.ne.s32.totalorder %s5278_s20, %s5274_s19 }
  0x17   : > { %p138_p2 = scmp.eq.s32.totalorder %s5290_s23, 0  ;;  %s6280_s24 = smov (%p43_p0, %s42_s24), 0 }
  0x18   : > { %6244 = sst [smem:[#allocation21_spill]] %s6280_s24  ;;  %p4381_p4 = scmp.lt.s32.totalorder %s5290_s23, 2 }
  0x19   : > { %p139_p3 = por %p138_p2, %p137_p1  ;;  %s127_s26 = ssub.s32 %s5286_s22, %s6280_s24 }
  0x1a   : > { %p128_p5 = scmp.eq.s32.totalorder %s127_s26, 0  ;;  %s517_s28 = sand.u32 1, %s5278_s20  }
  0x1b   : > { %s4344_s29 = smul.u32 3072, %s5286_s22  ;;  %s6246_s3 = sld [smem:[#allocation27_spill]] }
  0x1c   : > { %s5433_s30 = scalar_select %p128_p5, %s5278_s20, %s130_s25  }
  0x1d   : > { %s4343_s16 = smul.u32 192, %s517_s28  ;;  %p5438_p6 = pnand %p4381_p4, %p139_p3 }
  0x1e   : > { %6245 = sst [smem:[#allocation22_spill]] %s5433_s30  ;;  %s5442_s27 = sshll.u32 %s517_s28, 6 }
  0x1f   : > { %s519_s14 = scalar_lea.vmem [#allocation6], %s4343_s16  ;;  %s6248_s26 = sand.u32 1, %s5290_s23  }
  0x20   : > { %s526_s13 = sshll.u32 %s519_s14, 4  ;;  %s5446_s24 = scalar_lea.sflag [#allocation7], %s6248_s26  ;;  %s527_s13 = int_to_ptr.vmem [resolvable:$true] %s526_s13 }
  0x21   : > { %s525_s2 = scalar_lea.hbm %s6246_s3, %s4344_s29  ;;  %p5068_p7 = pneg %p5438_p6 }
  0x22   : > { %s5079_s25 = scalar_lea.vmem %s527_s13, 3072  ;;  %s5292_s15 = smov [#allocation6]  }
  0x23   : > { %p5080_p8 = scmp.ne.s32.totalorder %s527_s13, %s5079_s25  ;;  %s5084_s29 = sshll.u32 %s5292_s15, 4  ;;  %s5085_s29 = int_to_ptr.vmem [resolvable:$false] %s5084_s29 }
  0x24   : > { %s5086_s17 = scalar_lea.vmem %s5085_s29, 6144  ;;  %p5087_p11 = scmp.lt.s32.totalorder %s527_s13, %s5085_s29 }
  0x25   : > { %p5082_p9 = pnand %p5080_p8, %p5068_p7  ;;  %p5088_p12 = scmp.lt.s32.totalorder %s5086_s17, %s5079_s25 }
  0x27   : > { %p5083_p10 = pneg %p5082_p9  ;;  %p5089_p13 = por %p5088_p12, %p5087_p11 }
  0x29   : > { %p5090_p0 = pnand %p5089_p13, %p5083_p10 }
  0x2b   : > { %5093 = shalt.err (!%p5090_p0)
}
  0x2c   : > { %s5293_s14 = smov 192   ;;  %s5294_s28 = smov 12  }
  0x2d   : > { %4370 = dma.hbm_to_vmem [thread:$0]  (!%p5438_p6), %s525_s2, 3072, %s527_s13, %s5446_s24, %s5293_s14, %s5293_s14, %s5294_s28  }
  0x2e   : > { %s5457_s16 = sshll.u32 %s5286_s22, 10  ;;  %s6249_s7 = sld [smem:[#allocation29_spill]] }
  0x2f   : > { %s574_s29 = scalar_lea.vmem [#allocation9], %s5442_s27  ;;  %s6250_s3 = sand.u32 1, %s5290_s23  }
  0x30   : > { %s581_s17 = sshll.u32 %s574_s29, 4  ;;  %s5466_s30 = scalar_lea.sflag [#allocation10], %s6250_s3  ;;  %s582_s17 = int_to_ptr.vmem [resolvable:$true] %s581_s17 }
  0x31   : > { %s5107_s20 = scalar_lea.vmem %s582_s17, 1024  ;;  %s5295_s2 = smov [#allocation9]  }
  0x32   : > { %p5108_p1 = scmp.ne.s32.totalorder %s582_s17, %s5107_s20  ;;  %s5112_s13 = sshll.u32 %s5295_s2, 4  ;;  %s5113_s13 = int_to_ptr.vmem [resolvable:$false] %s5112_s13 }
  0x33   : > { %s5114_s14 = scalar_lea.vmem %s5113_s13, 2048  ;;  %p5115_p4 = scmp.lt.s32.totalorder %s582_s17, %s5113_s13 }
  0x34   : > { %s580_s25 = scalar_lea.hbm %s6249_s7, %s5457_s16  ;;  %p5110_p2 = pnand %p5108_p1, %p5068_p7 }
  0x35   : > { %p5116_p5 = scmp.lt.s32.totalorder %s5114_s14, %s5107_s20 }
  0x36   : > { %p5111_p3 = pneg %p5110_p2 }
  0x37   : > { %p5117_p8 = por %p5116_p5, %p5115_p4 }
  0x39   : > { %p5118_p9 = pnand %p5117_p8, %p5111_p3 }
  0x3b   : > { %5121 = shalt.err (!%p5118_p9)
}
  0x3c   : > { %s6221_s28 = smov 64   ;;  %s6223_s3 = smov 4  }
  0x3d   : > { %4376 = dma.hbm_to_vmem [thread:$0]  (!%p5438_p6), %s580_s25, 1024, %s582_s17, %s5466_s30, %s6221_s28, %s6221_s28, %s6223_s3  }
  0x3e   : > { %s5478_s20 = sadd.s32 4294967295, %s5290_s23   ;;  %p143_p10 = scmp.ne.s32.totalorder %s5274_s19, %s5270_s18 }
  0x3f   : > { %6251 = sst [smem:[#allocation23_spill]] %s5478_s20  ;;  %p144_p11 = scmp.eq.s32.totalorder %s5478_s20, 0 }
  0x40   : > { %p3968_p12 = scmp.ge.s32.totalorder %s5290_s23, 1  ;;  %p466_p13 = scmp.lt.s32.totalorder %s5290_s23, 3 }
  0x41   : > { %p5487_p0 = por %p144_p11, %p143_p10  ;;  %s5298_s25 = smov [#allocation3]  }
  0x42   : > { %p5491_p1 = pnand %p3968_p12, %p466_p13  ;;  %s491_s29 = sshll.u32 %s5298_s25, 4  ;;  %s492_s29 = int_to_ptr.vmem [resolvable:$true] %s491_s29 }
  0x43   : > { %s6254_s5 = sld [smem:[#allocation28_spill]]  ;;  %s547_s14 = scalar_lea.vmem [#allocation8], %s5442_s27 }
  0x44   : > { %p4363_p2 = pneg %p5491_p1  ;;  %s554_s28 = sshll.u32 %s547_s14, 4  ;;  %s5508_s28 = int_to_ptr.vmem [resolvable:$true] %s554_s28 }
  0x45   : > { %s6256_s9 = sld [smem:[#allocation30_spill]]  ;;  %s5133_s22 = scalar_lea.vmem %s492_s29, 32 }
  0x46   : > { %p5503_p3 = pnand %p4363_p2, %p144_p11  ;;  %p5134_p5 = scmp.ne.s32.totalorder %s492_s29, %s5133_s22 }
  0x47   : > { %p5141_p10 = scmp.lt.s32.totalorder %s492_s29, %s492_s29  ;;  %p5142_p12 = scmp.lt.s32.totalorder %s5133_s22, %s5133_s22 }
  0x48   : > { %p5124_p4 = pneg %p5503_p3 }
  0x49   : > { %p5143_p13 = por %p5142_p12, %p5141_p10 }
  0x4a   : > { %p5136_p8 = pnand %p5134_p5, %p5124_p4 }
  0x4c   : > { %p5137_p9 = pneg %p5136_p8 }
  0x4e   : > { %p5144_p2 = pnand %p5143_p13, %p5137_p9 }
  0x50   : > { %5147 = shalt.err (!%p5144_p2)
}
  0x51   : > { %s5299_s17 = smov 16   ;;  %s5300_s18 = smov 1  }
  0x52   : > { %s6257_s1 = sld [smem:[#allocation25_spill]]  ;;  %s5161_s14 = scalar_lea.vmem %s5508_s28, 1024 }
  0x53   : > { %p5162_p4 = scmp.ne.s32.totalorder %s5508_s28, %s5161_s14  ;;  %s5301_s22 = smov [#allocation8]  }
  0x54   : > { %s5166_s25 = sshll.u32 %s5301_s22, 4  ;;  %s5167_s25 = int_to_ptr.vmem [resolvable:$false] %s5166_s25 }
  0x55   : > { %p5164_p5 = pnand %p5162_p4, %p5068_p7  ;;  %s5168_s2 = scalar_lea.vmem %s5167_s25, 2048 }
  0x56   : > { %p5169_p9 = scmp.lt.s32.totalorder %s5508_s28, %s5167_s25  ;;  %p5170_p10 = scmp.lt.s32.totalorder %s5168_s2, %s5161_s14 }
  0x57   : > { %p5165_p8 = pneg %p5164_p5 }
  0x58   : > { %4366 = dma.hbm_to_vmem [thread:$0]  (!%p5503_p3), %s6257_s1, 32, %s492_s29, [#allocation4], %s5299_s17, %s5299_s17, %s5300_s18  }
  0x59   : > { %p5171_p12 = por %p5170_p10, %p5169_p9 }
  0x5b   : > { %p5172_p13 = pnand %p5171_p12, %p5165_p8 }
  0x5d   : > { %5175 = shalt.err (!%p5172_p13)
}
  0x5e   : > { %s6258_s13 = smov 4   ;;  %s6259_s7 = smov 64  }
  0x5f   : > { %s6260_s18 = scalar_lea.hbm %s6254_s5, %s5457_s16  ;;  %s601_s25 = scalar_lea.vmem [#allocation11], %s5442_s27 }
  0x60   : > { %4373 = dma.hbm_to_vmem [thread:$0]  (!%p5438_p6), %s6260_s18, 1024, %s5508_s28, %s5446_s24, %s6259_s7, %s6259_s7, %s6258_s13  }
  0x61   : > { %s608_s2 = sshll.u32 %s601_s25, 4  ;;  %s5302_s14 = smov [#allocation11]   ;;  %s609_s2 = int_to_ptr.vmem [resolvable:$true] %s608_s2 }
  0x62   : > { %s5189_s3 = scalar_lea.vmem %s609_s2, 1024  ;;  %s5194_s22 = sshll.u32 %s5302_s14, 4  ;;  %s5195_s22 = int_to_ptr.vmem [resolvable:$false] %s5194_s22 }
  0x63   : > { %p5190_p3 = scmp.ne.s32.totalorder %s609_s2, %s5189_s3  ;;  %s5196_s1 = scalar_lea.vmem %s5195_s22, 2048 }
  0x64   : > { %p5197_p5 = scmp.lt.s32.totalorder %s609_s2, %s5195_s22  ;;  %p5198_p8 = scmp.lt.s32.totalorder %s5196_s1, %s5189_s3 }
  0x65   : > { %p5192_p2 = pnand %p5190_p3, %p5068_p7 }
  0x66   : > { %p5199_p9 = por %p5198_p8, %p5197_p5 }
  0x67   : > { %p5193_p4 = pneg %p5192_p2 }
  0x69   : > { %p5200_p10 = pnand %p5199_p9, %p5193_p4 }
  0x6b   : > { %5203 = shalt.err (!%p5200_p10)
}
  0x6c   : > { %s6261_s28 = scalar_lea.hbm %s6256_s9, %s5457_s16  ;;  %650 = sbr.rel (%p5491_p1) target bundleno = 3268 (0xcc4), region = 80 }
  0x6d   : > { %4379 = dma.hbm_to_vmem [thread:$0]  (!%p5438_p6), %s6261_s28, 1024, %s609_s2, %s5466_s30, %s6259_s7, %s6259_s7, %s6258_s13  }
  0x71   : > { %5253 = dma.done.wait (%p144_p11), [#allocation4], 32  }
  0x72   : > { %5255 = vsyncadd (%p144_p11), [#allocation4], 4294967264  ;;  %s656_s0 = sand.u32 1, %s5478_s20   ;;  %s658_s1 = sand.u32 1, %s5274_s19  }
  0x73   : > { %s4345_s29 = smul.u32 192, %s658_s1  ;;  %s657_s17 = scalar_lea.sflag [#allocation7], %s656_s0 }
  0x75   : > { %s5562_s18 = scalar_lea.vmem [#allocation6], %s4345_s29 }
  0x76   : > { %5257 = dma.done.wait (%p5487_p0), %s657_s17, 4096  }
  0x77   : > { %5259 = vsyncadd (%p5487_p0), %s657_s17, 4294963200  ;;  %s3985_s30 = sshll.u32 %s658_s1, 6  ;;  %s675_s15 = scalar_lea.sflag [#allocation10], %s656_s0 }
  0x78   : > { %s5568_s16 = scalar_lea.vmem [#allocation8], %s3985_s30  ;;  %s5570_s13 = scalar_lea.vmem [#allocation9], %s3985_s30 }
  0x79   : > { %5261 = dma.done.wait (%p5487_p0), %s675_s15, 2048  }
  0x7a   : > { %5263 = vsyncadd (%p5487_p0), %s675_s15, 4294965248  ;;  %p796_p6 = scmp.lt.s32.totalorder %s5282_s21, 1  ;;  %s6262_s22 = sld [smem:[#allocation31_spill]] }
  0x7b   : > { %s6263_s28 = sld [smem:[#allocation32_spill]]  ;;  %s5614_s20 = scalar_lea.vmem [#allocation11], %s3985_s30 }
  0x7c   : > { %s5578_s7 = scalar_select %p796_p6, %s5282_s21, 1 }
  0x7d   : > { %p3988_p7 = scmp.ne.s32.totalorder %s5282_s21, 0 }
  0x7e   : > { %s4346_s25 = smul.u32 3, %s5578_s7  ;;  %s811_s9 = scalar_lea.vmem %s6212_s11, %s5578_s7 }
  0x7f   : > { %s814_s3 = scalar_lea.vmem %s6213_s12, %s5578_s7  ;;  %826 = sbr.rel (%p3988_p7) target bundleno = 138 (0x8a), region = 104 }
  0x80   : > { %s5596_s17 = scalar_lea.vmem %s6205_s4, %s4346_s25  ;;  %s817_s24 = scalar_lea.vmem %s6262_s22, %s5578_s7 }
  0x81   : > { %s820_s0 = scalar_lea.vmem %s6263_s28, %s5578_s7  ;;  %s6264_s1 = sld [smem:[#allocation24_spill]] (!%p3988_p7) }
  0x87   : > { %v827_v0 = vld [vmem:[%s6264_s1] sm:$0xff]  ;;  %v828_v1 = vld [vmem:[%s6264_s1 + $0x8] sm:$0xff]  ;;  %v829_v2 = vld [vmem:[%s6264_s1 + $0x10] sm:$0xff] }
  0x88   : > { %831 = vst [vmem:[#allocation2 + $0x10] sm:$0xff] %v827_v0  ;;  %832 = vst [vmem:[#allocation2] sm:$0xff] %v828_v1  ;;  %v830_v3 = vld [vmem:[%s6264_s1 + $0x18] sm:$0xff] }
  0x89   : > { %833 = vst [vmem:[#allocation2 + $0x18] sm:$0xff] %v829_v2  ;;  %834 = vst [vmem:[#allocation2 + $0x8] sm:$0xff] %v830_v3 }
  0x8a PF: > { %v4910_v4 = vld [vmem:[%s5562_s18 + $0xac] ss:$12 sps:$4 sm:$0xff]   ;;  %v4912_v5 = vld [vmem:[%s5562_s18 + $0xa8] ss:$12 sps:$4 sm:$0xff]   ;;  %v5303_v6 = vmov 0   ;;  %v875_v27 = vlaneseq  ;;  %v5304_v59 = vmov 0.0   ;;  %s6266_s19 = scalar_lea.vmem %s6207_s6, %s5578_s7  ;;  %s6267_s30 = scalar_lea.vmem %s6209_s8, %s5578_s7 }
  0x8b   : > { %1050 = vmatprep.mubr.bf16.mxu0 %v5303_v6  ;;  %1018 = vmatprep.subr.bf16.mxu0 %v4910_v4  ;;  %v4913_v7 = vld [vmem:[%s5562_s18 + $0x94] ss:$12 sps:$4 sm:$0xff]   ;;  %v4915_v8 = vld [vmem:[%s5562_s18 + $0x90] ss:$12 sps:$4 sm:$0xff]   ;;  %v4918_v10 = vld [vmem:[%s5562_s18 + $0x78] ss:$12 sps:$4 sm:$0xff]  }
  0x8c   : > { %1019 = vmatpush1.bf16.msra.mxu0 %v4912_v5  ;;  %v4916_v9 = vld [vmem:[%s5562_s18 + $0x7c] ss:$12 sps:$4 sm:$0xff]   ;;  %v4919_v11 = vld [vmem:[%s5562_s18 + $0x64] ss:$12 sps:$4 sm:$0xff]   ;;  %v4921_v13 = vld [vmem:[%s5562_s18 + $0x60] ss:$12 sps:$4 sm:$0xff]  }
  0x8d   : > { %1020 = vmatprep.subr.bf16.mxu0 %v4913_v7  ;;  %v4922_v15 = vld [vmem:[%s5562_s18 + $0x4c] ss:$12 sps:$4 sm:$0xff]   ;;  %v4924_v17 = vld [vmem:[%s5562_s18 + $0x48] ss:$12 sps:$4 sm:$0xff]   ;;  %v4927_v19 = vld [vmem:[%s5562_s18 + $0x30] ss:$12 sps:$4 sm:$0xff]  }
  0x8e   : > { %v4925_v18 = vld [vmem:[%s5562_s18 + $0x34] ss:$12 sps:$4 sm:$0xff]   ;;  %v4928_v20 = vld [vmem:[%s5562_s18 + $0x1c] ss:$12 sps:$4 sm:$0xff]   ;;  %v4930_v21 = vld [vmem:[%s5562_s18 + $0x18] ss:$12 sps:$4 sm:$0xff]  }
  0x8f   : > { %v835_v12 = vld [vmem:[#allocation2 + $0x10] sm:$0xff]  ;;  %v836_v14 = vld [vmem:[#allocation2] sm:$0xff]  ;;  %v5650_v28 = vshrl.u32 %v875_v27, 7  ;;  %vm5305_vm0 = vmmov 0   ;;  %vm1852_vm1 = vcmask 261120   ;;  %vm2235_vm2 = vcmask 130048  }
  0x90   : > { %1021 = vmatpush1.bf16.msra.mxu0 %v4915_v8  ;;  %v839_v16 = vpack.c.bf16 %v836_v14, %v835_v12  ;;  %v4931_v22 = vld [vmem:[%s5562_s18 + $0x4] ss:$12 sps:$4 sm:$0xff]   ;;  %v4933_v23 = vld [vmem:[%s5562_s18] ss:$12 sps:$4 sm:$0xff]   ;;  %v837_v24 = vld [vmem:[#allocation2 + $0x18] sm:$0xff]  ;;  %s6265_s2 = sld [smem:[#allocation26_spill]] }
  0x91   : > { %1022 = vmatprep.subr.bf16.mxu0 %v4916_v9  ;;  %v838_v25 = vld [vmem:[#allocation2 + $0x8] sm:$0xff]  ;;  %v877_v29 = vsub.s32 0, %v5650_v28  ;;  %v5654_v30 = vld [vmem:[%s5596_s17] sm:$0x7]  ;;  %v881_v34 = vsub.s32 1, %v5650_v28  ;;  %s6268_s17 = scalar_lea.vmem %s6211_s10, %s5578_s7  ;;  %p4062_p11 = scmp.ge.s32.totalorder %s5282_s21, 1 }
  0x92   : > { %4167 = vmatprep.mubr.bf16.mxu1 %v839_v16  ;;  %v5647_v26 = vpack.c.bf16 %v838_v25, %v837_v24  ;;  %v4934_v58 = vld [vmem:[%s5562_s18 + $0xb0] ss:$12 sps:$4 sm:$0xff]  }
  0x93   : > { %v878_v32 = vrot.slane %v5654_v30, %v877_v29  ;;  %v882_v38 = vrot.slane %v5654_v30, %v881_v34  ;;  %4151 = vmatprep.subr.bf16.mxu1 %v4934_v58 }
  0x94   : > { %1023 = vmatpush1.bf16.msra.mxu0 %v4918_v10  ;;  %4152 = vmatpush3.bf16.msra.mxu1 %v4934_v58 }
  0x95   : > { %1024 = vmatprep.subr.bf16.mxu0 %v4919_v11 }
  0x98   : > { %1025 = vmatpush1.bf16.msra.mxu0 %v4921_v13 }
  0x99   : > { %1026 = vmatprep.subr.bf16.mxu0 %v4922_v15  ;;  %v4935_v15 = vld [vmem:[%s5562_s18 + $0x98] ss:$12 sps:$4 sm:$0xff]  }
  0x9a   : > { %4153 = vmatprep.subr.bf16.mxu1 %v4935_v15 }
  0x9b   : > { %4154 = vmatpush3.bf16.msra.mxu1 %v4935_v15 }
  0x9c   : > { %1027 = vmatpush1.bf16.msra.mxu0 %v4924_v17 }
  0x9d   : > { %1028 = vmatprep.subr.bf16.mxu0 %v4925_v18 }
  0xa0   : > { %1029 = vmatpush1.bf16.msra.mxu0 %v4927_v19 }
  0xa1   : > { %1030 = vmatprep.subr.bf16.mxu0 %v4928_v20 }
  0xa4   : > { %1031 = vmatpush1.bf16.msra.mxu0 %v4930_v21 }
  0xa5   : > { %1032 = vmatprep.subr.bf16.mxu0 %v4931_v22  ;;  %v4936_v22 = vld [vmem:[%s5562_s18 + $0x80] ss:$12 sps:$4 sm:$0xff]  }
  0xa6   : > { %4155 = vmatprep.subr.bf16.mxu1 %v4936_v22 }
  0xa7   : > { %4156 = vmatpush3.bf16.msra.mxu1 %v4936_v22 }
  0xa8   : > { %1033 = vmatpush1.bf16.msra.mxu0 %v4933_v23 }
  0xa9   : > { %4171 = vmatprep.subr.bf16.mxu0 %v5304_v59 }
  0xab   : > { %1051 = vmatmul.mubr.bf16.vlgmr.msra.gmra.mxu0 %v839_v16 }
  0xac   : > { %1060 = vmatprep.mubr.bf16.mxu0 %v5303_v6 }
  0xb3   : > { %1061 = vmatmul.mubr.bf16.gmra.mxu0 %v5647_v26 }
  0xb4   : > { %4175 = vmatprep.mubr.msk.bf16.mxu0 %vm5305_vm0, %v5304_v59 }
 0x16b   : > { %v1052_v31 = vpop.f32.mrf.mxu0 }
 0x16c   : > { %v1053_v36 = vadd.f32 %v1052_v31, %v878_v32  ;;  %v4937_v31 = vld [vmem:[%s5562_s18 + $0x68] ss:$12 sps:$4 sm:$0xff]  }
 0x16d   : > { %v1054_v33 = vpop.f32.mrf.mxu0  ;;  %4157 = vmatprep.subr.bf16.mxu1 %v4937_v31 }
 0x16e   : > { %v1120_v41 = vmul.f32 0.17677669, %v1053_v36  ;;  %v1055_v43 = vadd.f32 %v1054_v33, %v882_v38  ;;  %4158 = vmatpush3.bf16.msra.mxu1 %v4937_v31 }
 0x16f   : > { %v1056_v35 = vpop.f32.mrf.mxu0 }
 0x170   : > { %v1057_v44 = vadd.f32 %v1056_v35, %v878_v32 }
 0x171   : > { %v1058_v37 = vpop.f32.mrf.mxu0 }
 0x172   : > { %v1121_v52 = vmul.f32 0.17677669, %v1057_v44  ;;  %v1059_v53 = vadd.f32 %v1058_v37, %v882_v38 }
 0x173   : > { %v1062_v39 = vpop.f32.mrf.mxu0 }
 0x174   : > { %v1063_v40 = vadd.f32 %v1062_v39, %v878_v32  ;;  %v4938_v39 = vld [vmem:[%s5562_s18 + $0x50] ss:$12 sps:$4 sm:$0xff]  }
 0x175   : > { %v1064_v42 = vpop.f32.mrf.mxu0  ;;  %4159 = vmatprep.subr.bf16.mxu1 %v4938_v39 }
 0x176   : > { %v1122_v45 = vmul.f32 0.17677669, %v1063_v40  ;;  %v1065_v46 = vadd.f32 %v1064_v42, %v882_v38  ;;  %4160 = vmatpush3.bf16.msra.mxu1 %v4938_v39 }
 0x177   : > { %v1066_v47 = vpop.f32.mrf.mxu0 }
 0x178   : > { %v1067_v48 = vadd.f32 %v1066_v47, %v878_v32  ;;  %v4530_v49 = vpack.i.bf16 %v1065_v46, %v1055_v43  ;;  %v4446_v50 = vpack.i.bf16 %v1122_v45, %v1120_v41  ;;  %v4939_v43 = vld [vmem:[%s5562_s18 + $0x38] ss:$12 sps:$4 sm:$0xff]   ;;  %v4940_v45 = vld [vmem:[%s5562_s18 + $0x20] ss:$12 sps:$4 sm:$0xff]  }
 0x179   : > { %v1068_v51 = vpop.f32.mrf.mxu0  ;;  %4161 = vmatprep.subr.bf16.mxu1 %v4939_v43 }
 0x17a   : > { %v1123_v54 = vmul.f32 0.17677669, %v1067_v48  ;;  %v1069_v55 = vadd.f32 %v1068_v51, %v882_v38  ;;  %4531 = vxpose.xlu1.b32.start [1/2] (short) %v4530_v49, 128  ;;  %4447 = vxpose.xlu0.b32.start [1/2] (short) %v4446_v50, 128  ;;  %v4941_v49 = vld [vmem:[%s5562_s18 + $0x8] ss:$12 sps:$4 sm:$0xff]  }
 0x17b   : > { %4162 = vmatpush3.bf16.msra.mxu1 %v4939_v43 }
 0x17c   : > { %v4532_v56 = vpack.i.bf16 %v1069_v55, %v1059_v53  ;;  %v4448_v57 = vpack.i.bf16 %v1123_v54, %v1121_v52  ;;  %4163 = vmatprep.subr.bf16.mxu1 %v4940_v45 }
 0x17e   : > { %4533 = vxpose.xlu1.b32.end [2/2] (short) %v4532_v56, 128  ;;  %4449 = vxpose.xlu0.b32.end [2/2] (short) %v4448_v57, 128 }
 0x17f   : > { %4164 = vmatpush3.bf16.msra.mxu1 %v4940_v45 }
 0x180   : > { %4165 = vmatprep.subr.bf16.mxu1 %v4941_v49 }
 0x183   : > { %4166 = vmatpush3.bf16.msra.mxu1 %v4941_v49 }
 0x184   : > { %4187 = vmatprep.subr.bf16.mxu1 %v5304_v59 }
 0x186   : > { %4168 = vmatmul.mubr.bf16.vlgmr.msra.gmra.mxu1 %v5647_v26 }
 0x187   : > { %4191 = vmatprep.mubr.msk.bf16.mxu1 %vm5305_vm0, %v5304_v59 }
 0x1f6   : > { %v5661_v60 = vpop.trf.xlu0  ;;  %v5663_v61 = vpop.trf.xlu1 }
 0x1f7   : > { %v4535_v5 = vunpack.i.l.bf16 %v5663_v61  ;;  %v4451_v13 = vunpack.i.l.bf16 %v5661_v60  ;;  %v4454_v44 = vunpack.i.h.bf16 %v5661_v60 }
 0x1fa   : > { %v5665_v62 = vpop.trf.xlu0  ;;  %v5667_v63 = vpop.trf.xlu1 }
 0x1fb   : > { %v4540_v7 = vunpack.i.l.bf16 %v5667_v63  ;;  %v4456_v19 = vunpack.i.l.bf16 %v5665_v62  ;;  %v4459_v48 = vunpack.i.h.bf16 %v5665_v62 }
 0x1fd   : > { %v1836_v14 = vpack.c.bf16 %v4540_v7, %v4535_v5 }
 0x1fe   : > { %v5669_v0 = vpop.trf.xlu0  ;;  %v5671_v1 = vpop.trf.xlu1 }
 0x1ff   : > { %v4545_v3 = vunpack.i.l.bf16 %v5671_v1  ;;  %v4461_v25 = vunpack.i.l.bf16 %v5669_v0  ;;  %v4464_v52 = vunpack.i.h.bf16 %v5669_v0 }
 0x202   : > { %v5673_v2 = vpop.trf.xlu0  ;;  %v5676_v4 = vpop.trf.xlu1 }
 0x203   : > { %v4550_v8 = vunpack.i.l.bf16 %v5676_v4  ;;  %v4466_v36 = vunpack.i.l.bf16 %v5673_v2  ;;  %v4469_v57 = vunpack.i.h.bf16 %v5673_v2 }
 0x205   : > { %v1837_v10 = vpack.c.bf16 %v4550_v8, %v4545_v3 }
 0x206   : > { %v5681_v9 = vpop.trf.xlu0  ;;  %v5683_v11 = vpop.trf.xlu1 }
 0x207   : > { %v4471_v12 = vunpack.i.l.bf16 %v5681_v9  ;;  %4172 = vmatpush3.bf16.msra.mxu0 %v1837_v10  ;;  %v4474_v45 = vunpack.i.h.bf16 %v5681_v9 }
 0x208   : > { %4173 = vmatprep.subr.bf16.mxu0 %v5304_v59 }
 0x209   : > { %v4614_v16 = vpack.i.bf16 %v4471_v12, %v4451_v13 }
 0x20a   : > { %v5689_v17 = vpop.trf.xlu0  ;;  %v5691_v18 = vpop.trf.xlu1 }
 0x20b   : > { %4615 = vxpose.xlu0.b32.start [1/4] (short) (narrow) %v4614_v16, 16  ;;  %v4476_v20 = vunpack.i.l.bf16 %v5689_v17  ;;  %4174 = vmatpush3.bf16.msra.mxu0 %v1836_v14 }
 0x20c   : > { %4179 = vmatprep.subr.bf16.mxu0 %v5304_v59 }
 0x20d   : > { %v4616_v21 = vpack.i.bf16 %v4476_v20, %v4456_v19 }
 0x20e   : > { %v5697_v23 = vpop.trf.xlu0  ;;  %v5699_v24 = vpop.trf.xlu1 }
 0x20f   : > { %4617 = vxpose.xlu0.b32.cont [2/4] (short) (narrow) %v4616_v21, 16  ;;  %v4481_v27 = vunpack.i.l.bf16 %v5697_v23  ;;  %v4565_v33 = vunpack.i.l.bf16 %v5699_v24  ;;  %v4484_v49 = vunpack.i.h.bf16 %v5697_v23  ;;  %v4560_v23 = vunpack.i.l.bf16 %v5691_v18 }
 0x211   : > { %v4618_v29 = vpack.i.bf16 %v4481_v27, %v4461_v25 }
 0x212   : > { %v5706_v32 = vpop.trf.xlu0  ;;  %v5709_v34 = vpop.trf.xlu1 }
 0x213   : > { %4619 = vxpose.xlu0.b32.cont [3/4] (short) (narrow) %v4618_v29, 16  ;;  %v4486_v35 = vunpack.i.l.bf16 %v5706_v32  ;;  %v4570_v37 = vunpack.i.l.bf16 %v5709_v34  ;;  %v4573_v43 = vunpack.i.h.bf16 %v5709_v34 }
 0x215   : > { %v4620_v38 = vpack.i.bf16 %v4486_v35, %v4466_v36  ;;  %v5717_v42 = vpack.c.bf16 %v4570_v37, %v4565_v33 }
 0x216   : > { %v4490_v40 = vpop.trf.xlu0  ;;  %v5715_v41 = vpop.trf.xlu1 }
 0x217   : > { %4621 = vxpose.xlu0.b32.end [4/4] (short) (narrow) %v4620_v38, 16  ;;  %v4491_v58 = vunpack.i.l.bf16 %v4490_v40  ;;  %v4575_v62 = vunpack.i.l.bf16 %v5715_v41  ;;  %v4494_v8 = vunpack.i.h.bf16 %v4490_v40  ;;  %v4568_v40 = vunpack.i.h.bf16 %v5699_v24 }
 0x21a   : > { %v4495_v46 = vpop.trf.xlu0  ;;  %v5722_v47 = vpop.trf.xlu1 }
 0x21b   : > { %1316 = vxpose.xlu0.b32.start [1/4] (short) (narrow) %v4454_v44, 16  ;;  %v4580_v3 = vunpack.i.l.bf16 %v5722_v47  ;;  %v4496_v10 = vunpack.i.l.bf16 %v4495_v46  ;;  %v4499_v16 = vunpack.i.h.bf16 %v4495_v46  ;;  %v5749_v46 = vpack.c.bf16 %v4573_v43, %v4568_v40 }
 0x21d   : > { %v1840_v14 = vpack.c.bf16 %v4580_v3, %v4575_v62 }
 0x21e   : > { %v4500_v50 = vpop.trf.xlu0  ;;  %v4584_v51 = vpop.trf.xlu1 }
 0x21f   : > { %1317 = vxpose.xlu0.b32.cont [2/4] (short) (narrow) %v4459_v48, 16  ;;  %v4585_v54 = vunpack.i.l.bf16 %v4584_v51  ;;  %v4501_v20 = vunpack.i.l.bf16 %v4500_v50  ;;  %v4504_v25 = vunpack.i.h.bf16 %v4500_v50  ;;  %v4588_v37 = vunpack.i.h.bf16 %v4584_v51 }
 0x220   : > { %v4479_v48 = vunpack.i.h.bf16 %v5689_v17  ;;  %v4489_v50 = vunpack.i.h.bf16 %v5706_v32  ;;  %v4555_v17 = vunpack.i.l.bf16 %v5683_v11 }
 0x222   : > { %v4505_v53 = vpop.trf.xlu0  ;;  %v4589_v55 = vpop.trf.xlu1  ;;  %v1838_v32 = vpack.c.bf16 %v4560_v23, %v4555_v17 }
 0x223   : > { %1318 = vxpose.xlu0.b32.cont [3/4] (short) (narrow) %v4464_v52, 16  ;;  %v4590_v56 = vunpack.i.l.bf16 %v4589_v55  ;;  %v4506_v27 = vunpack.i.l.bf16 %v4505_v53  ;;  %v4509_v35 = vunpack.i.h.bf16 %v4505_v53  ;;  %v4593_v38 = vunpack.i.h.bf16 %v4589_v55 }
 0x225   : > { %v1841_v0 = vpack.c.bf16 %v4590_v56, %v4585_v54  ;;  %v5746_v44 = vpack.c.bf16 %v4593_v38, %v4588_v37 }
 0x226   : > { %v4510_v60 = vpop.trf.xlu0  ;;  %v5731_v5 = vpop.trf.xlu1 }
 0x227   : > { %1319 = vxpose.xlu0.b32.end [4/4] (short) (narrow) %v4469_v57, 16  ;;  %v4511_v7 = vunpack.i.l.bf16 %v4510_v60  ;;  %4188 = vmatpush3.bf16.msra.mxu1 %v1841_v0  ;;  %v4514_v51 = vunpack.i.h.bf16 %v4510_v60  ;;  %v4595_v3 = vunpack.i.l.bf16 %v5731_v5 }
 0x228   : > { %4189 = vmatprep.subr.bf16.mxu1 %v5304_v59 }
 0x229   : > { %v4632_v2 = vpack.i.bf16 %v4511_v7, %v4491_v58 }
 0x22a   : > { %v4515_v12 = vpop.trf.xlu0  ;;  %v5737_v13 = vpop.trf.xlu1 }
 0x22b   : > { %v4516_v15 = vunpack.i.l.bf16 %v4515_v12  ;;  %4633 = vxpose.xlu1.b32.start [1/4] (short) (narrow) %v4632_v2, 16  ;;  %1380 = vxpose.xlu0.b32.start [1/4] (short) (narrow) %v4494_v8, 16  ;;  %v4519_v24 = vunpack.i.h.bf16 %v4515_v12  ;;  %v4600_v0 = vunpack.i.l.bf16 %v5737_v13 }
 0x22c   : > { %4190 = vmatpush3.bf16.msra.mxu1 %v1840_v14 }
 0x22d   : > { %v4634_v19 = vpack.i.bf16 %v4516_v15, %v4496_v10  ;;  %4203 = vmatprep.subr.bf16.mxu1 %v5304_v59  ;;  %v4548_v15 = vunpack.i.h.bf16 %v5671_v1 }
 0x22e   : > { %v4520_v26 = vpop.trf.xlu0  ;;  %v5740_v21 = vpop.trf.xlu1 }
 0x22f   : > { %v4521_v22 = vunpack.i.l.bf16 %v4520_v26  ;;  %4635 = vxpose.xlu1.b32.cont [2/4] (short) (narrow) %v4634_v19, 16  ;;  %1381 = vxpose.xlu0.b32.cont [2/4] (short) (narrow) %v4499_v16, 16  ;;  %v4524_v34 = vunpack.i.h.bf16 %v4520_v26  ;;  %v4605_v57 = vunpack.i.l.bf16 %v5740_v21  ;;  %v4553_v16 = vunpack.i.h.bf16 %v5676_v4 }
 0x230   : > { %v4608_v38 = vunpack.i.h.bf16 %v5740_v21 }
 0x231   : > { %v4636_v29 = vpack.i.bf16 %v4521_v22, %v4501_v20  ;;  %v1845_v37 = vpack.c.bf16 %v4553_v16, %v4548_v15 }
 0x232   : > { %v4525_v31 = vpop.trf.xlu0  ;;  %v5742_v36 = vpop.trf.xlu1 }
 0x233   : > { %v4526_v33 = vunpack.i.l.bf16 %v4525_v31  ;;  %4637 = vxpose.xlu1.b32.cont [3/4] (short) (narrow) %v4636_v29, 16  ;;  %1382 = vxpose.xlu0.b32.cont [3/4] (short) (narrow) %v4504_v25, 16  ;;  %v4529_v52 = vunpack.i.h.bf16 %v4525_v31  ;;  %v4610_v58 = vunpack.i.l.bf16 %v5742_v36  ;;  %v4558_v25 = vunpack.i.h.bf16 %v5683_v11 }
 0x235   : > { %v4638_v39 = vpack.i.bf16 %v4526_v33, %v4506_v27  ;;  %v1843_v7 = vpack.c.bf16 %v4610_v58, %v4605_v57  ;;  %v4563_v27 = vunpack.i.h.bf16 %v5691_v18  ;;  %v4538_v33 = vunpack.i.h.bf16 %v5663_v61 }
 0x236   : > { %v4583_v18 = vunpack.i.h.bf16 %v5722_v47  ;;  %v4603_v47 = vunpack.i.h.bf16 %v5737_v13 }
 0x237   : > { %4639 = vxpose.xlu1.b32.end [4/4] (short) (narrow) %v4638_v39, 16  ;;  %1383 = vxpose.xlu0.b32.end [4/4] (short) (narrow) %v4509_v35, 16  ;;  %v4543_v35 = vunpack.i.h.bf16 %v5667_v63  ;;  %v1846_v1 = vpack.c.bf16 %v4563_v27, %v4558_v25  ;;  %v4578_v63 = vunpack.i.h.bf16 %v5715_v41  ;;  %v4613_v39 = vunpack.i.h.bf16 %v5742_v36 }
 0x238   : > { %v4598_v41 = vunpack.i.h.bf16 %v5731_v5 }
 0x239   : > { %v1844_v4 = vpack.c.bf16 %v4543_v35, %v4538_v33  ;;  %v1848_v43 = vpack.c.bf16 %v4583_v18, %v4578_v63  ;;  %v1851_v36 = vpack.c.bf16 %v4613_v39, %v4608_v38 }
 0x23b   : > { %1348 = vxpose.xlu1.b32.start [1/4] (short) (narrow) %v4474_v45, 16 }
 0x23f   : > { %1349 = vxpose.xlu1.b32.cont [2/4] (short) (narrow) %v4479_v48, 16 }
 0x243   : > { %1350 = vxpose.xlu1.b32.cont [3/4] (short) (narrow) %v4484_v49, 16 }
 0x247   : > { %1351 = vxpose.xlu1.b32.end [4/4] (short) (narrow) %v4489_v50, 16  ;;  %v885_v50 = vsub.s32 2, %v5650_v28 }
 0x24b   : > { %1412 = vxpose.xlu1.b32.start [1/4] (short) (narrow) %v4514_v51, 16  ;;  %v5813_v51 = vrot.slane %v5654_v30, %v885_v50 }
 0x24f   : > { %1413 = vxpose.xlu1.b32.cont [2/4] (short) (narrow) %v4519_v24, 16  ;;  %v4169_v24 = vpop.f32.mrf.mxu1 }
 0x253   : > { %1414 = vxpose.xlu1.b32.cont [3/4] (short) (narrow) %v4524_v34, 16  ;;  %v5816_v34 = vadd.f32 %v4169_v24, %v5813_v51 }
 0x257   : > { %1415 = vxpose.xlu1.b32.end [4/4] (short) (narrow) %v4529_v52, 16  ;;  %v1105_v52 = vpop.f32.mrf.mxu1 }
 0x287   : > { %v4622_v9 = vpop.trf.xlu0 }
 0x288   : > { %v4623_v54 = vunpack.i.l.bf16 %v4622_v9  ;;  %v4626_v62 = vunpack.i.h.bf16 %v4622_v9  ;;  %v5819_v9 = vadd.f32 %v1105_v52, %v5813_v51 }
 0x28b   : > { %v4627_v53 = vpop.trf.xlu0 }
 0x28c   : > { %v4628_v55 = vunpack.i.l.bf16 %v4627_v53  ;;  %v4631_v60 = vunpack.i.h.bf16 %v4627_v53  ;;  %v4650_v53 = vpack.i.bf16 %v5816_v34, %v5819_v9 }
 0x28e   : > { %v1828_v56 = vpack.c.bf16 %v4628_v55, %v4623_v54  ;;  %v1829_v8 = vpack.c.bf16 %v4631_v60, %v4626_v62  ;;  %v4021_v54 = vld [vmem:[#allocation3] ss:$0 sm:$0xff] }
 0x290   : > { %4176 = vmatmul.mubr.msk.bf16.vlgmr.msra.gmra.mxu0 %vm1852_vm1, %v1828_v56 }
 0x291   : > { %4180 = vmatpush3.bf16.msra.mxu0 %v5717_v42  ;;  %4183 = vmatprep.mubr.msk.bf16.mxu0 %vm5305_vm0, %v5304_v59  ;;  %v1842_v42 = vpack.c.bf16 %v4600_v0, %v4595_v3 }
 0x292   : > { %4181 = vmatprep.subr.bf16.mxu0 %v5304_v59 }
 0x295   : > { %4182 = vmatpush3.bf16.msra.mxu0 %v1838_v32 }
 0x296   : > { %4195 = vmatprep.subr.bf16.mxu0 %v5304_v59 }
 0x297   : > { %v1332_v10 = vpop.trf.xlu0 }
 0x298   : > { %4184 = vmatmul.mubr.msk.bf16.vlgmr.msra.gmra.mxu0 %vm1852_vm1, %v1829_v8 }
 0x299   : > { %4196 = vmatpush3.bf16.msra.mxu0 %v1843_v7  ;;  %4199 = vmatprep.mubr.msk.bf16.mxu0 %vm5305_vm0, %v5304_v59 }
 0x29a   : > { %4197 = vmatprep.subr.bf16.mxu0 %v5304_v59 }
 0x29b   : > { %v1333_v22 = vpop.trf.xlu0 }
 0x29c   : > { %v1832_v61 = vpack.c.bf16 %v1333_v22, %v1332_v10 }
 0x29d   : > { %4198 = vmatpush3.bf16.msra.mxu0 %v1842_v42 }
 0x29e   : > { %4211 = vmatprep.subr.bf16.mxu0 %v5304_v59 }
 0x2a7   : > { %v4640_v2 = vpop.trf.xlu1  ;;  %v1396_v11 = vpop.trf.xlu0 }
 0x2a8   : > { %v4644_v12 = vunpack.i.h.bf16 %v4640_v2  ;;  %v4641_v14 = vunpack.i.l.bf16 %v4640_v2  ;;  %v5839_v2 = vpop.f32.mrf.mxu1 }
 0x2aa   : > { %v5841_v10 = vpop.f32.mrf.mxu1 }
 0x2ab   : > { %v4645_v19 = vpop.trf.xlu1  ;;  %v1397_v45 = vpop.trf.xlu0 }
 0x2ac   : > { %v4649_v20 = vunpack.i.h.bf16 %v4645_v19  ;;  %v4646_v26 = vunpack.i.l.bf16 %v4645_v19 }
 0x2ae   : > { %v1830_v29 = vpack.c.bf16 %v4646_v26, %v4641_v14  ;;  %v1831_v31 = vpack.c.bf16 %v4649_v20, %v4644_v12 }
 0x2b0   : > { %4192 = vmatmul.mubr.msk.bf16.vlgmr.msra.gmra.mxu1 %vm1852_vm1, %v1830_v29  ;;  %4200 = vmatmul.mubr.msk.bf16.vlgmr.msra.gmra.mxu0 %vm1852_vm1, %v1831_v31  ;;  %v4022_v29 = vld [vmem:[#allocation3 + $0x1] ss:$0 sm:$0xff] }
 0x2b1   : > { %4204 = vmatpush3.bf16.msra.mxu1 %v1845_v37  ;;  %4207 = vmatprep.mubr.msk.bf16.mxu1 %vm5305_vm0, %v5304_v59 }
 0x2b2   : > { %4205 = vmatprep.subr.bf16.mxu1 %v5304_v59  ;;  %4212 = vmatpush3.bf16.msra.mxu0 %v5749_v46  ;;  %v1834_v46 = vpack.c.bf16 %v1397_v45, %v1396_v11 }
 0x2b3   : > { %4213 = vmatprep.subr.bf16.mxu0 %v5304_v59  ;;  %4215 = vmatprep.mubr.msk.bf16.mxu0 %vm5305_vm0, %v5304_v59 }
 0x2b5   : > { %4206 = vmatpush3.bf16.msra.mxu1 %v1844_v4 }
 0x2b6   : > { %4219 = vmatprep.subr.bf16.mxu1 %v5304_v59  ;;  %4214 = vmatpush3.bf16.msra.mxu0 %v1846_v1 }
 0x2b7   : > { %v1364_v40 = vpop.trf.xlu1  ;;  %4227 = vmatprep.subr.bf16.mxu0 %v5304_v59 }
 0x2b8   : > { %4208 = vmatmul.mubr.msk.bf16.vlgmr.msra.gmra.mxu1 %vm1852_vm1, %v1832_v61 }
 0x2b9   : > { %4220 = vmatpush3.bf16.msra.mxu1 %v5746_v44  ;;  %4223 = vmatprep.mubr.msk.bf16.mxu1 %vm5305_vm0, %v5304_v59  ;;  %v1850_v44 = vpack.c.bf16 %v4603_v47, %v4598_v41 }
 0x2ba   : > { %4221 = vmatprep.subr.bf16.mxu1 %v5304_v59 }
 0x2bb   : > { %v1365_v21 = vpop.trf.xlu1 }
 0x2bc   : > { %v1833_v48 = vpack.c.bf16 %v1365_v21, %v1364_v40 }
 0x2bd   : > { %4222 = vmatpush3.bf16.msra.mxu1 %v1848_v43 }
 0x2be   : > { %4216 = vmatmul.mubr.msk.bf16.vlgmr.msra.gmra.mxu0 %vm1852_vm1, %v1833_v48  ;;  %4235 = vmatprep.subr.bf16.mxu1 %v5304_v59 }
 0x2bf   : > { %4228 = vmatpush3.bf16.msra.mxu0 %v1851_v36  ;;  %4231 = vmatprep.mubr.msk.bf16.mxu0 %vm5305_vm0, %v5304_v59 }
 0x2c0   : > { %4224 = vmatmul.mubr.msk.bf16.vlgmr.msra.gmra.mxu1 %vm1852_vm1, %v1834_v46  ;;  %4229 = vmatprep.subr.bf16.mxu0 %v5304_v59 }
 0x2c1   : > { %4237 = vmatprep.mubr.msk.bf16.mxu1 %vm5305_vm0, %v5304_v59 }
 0x2c3   : > { %4230 = vmatpush3.bf16.msra.mxu0 %v1850_v44 }
 0x2c4   : > { %4241 = vmatprep.subr.bf16.mxu0 %v5304_v59 }
 0x2c7   : > { %v1428_v5 = vpop.trf.xlu1 }
 0x2cb   : > { %v1429_v13 = vpop.trf.xlu1 }
 0x2cc   : > { %v1835_v49 = vpack.c.bf16 %v1429_v13, %v1428_v5 }
 0x2ce   : > { %4232 = vmatmul.mubr.msk.bf16.vlgmr.msra.gmra.mxu0 %vm1852_vm1, %v1835_v49 }
 0x2cf   : > { %4243 = vmatprep.mubr.msk.bf16.mxu0 %vm5305_vm0, %v5304_v59 }
 0x350   : > { %v1890_v55 = vpop.f32.mrf.mxu0 }
 0x351   : > { %v5823_v17 = vadd.f32 %v4021_v54, %v1890_v55 }
 0x352   : > { %v4177_v28 = vpop.f32.mrf.mxu0 }
 0x353   : > { %v2236_v30 = vsel %vm2235_vm2, %v5823_v17, -inf }
 0x354   : > { %2237 = vmax.xlane.f32.xlu0 %v2236_v30  ;;  %v1893_v23 = vpop.f32.mrf.mxu0 }
 0x355   : > { %v5827_v56 = vadd.f32 %v4021_v54, %v1893_v23 }
 0x356   : > { %v4178_v32 = vpop.f32.mrf.mxu0 }
 0x357   : > { %v2239_v57 = vsel %vm2235_vm2, %v5827_v56, -inf }
 0x358   : > { %2240 = vmax.xlane.f32.xlu1 %v2239_v57  ;;  %v1934_v58 = vpop.f32.mrf.mxu0 }
 0x359   : > { %v5831_v60 = vadd.f32 %v4021_v54, %v1934_v58 }
 0x35a   : > { %v4185_v62 = vpop.f32.mrf.mxu0 }
 0x35b   : > { %v2242_v3 = vsel %vm2235_vm2, %v5831_v60, -inf }
 0x35c   : > { %2243 = vmax.xlane.f32.xlu1 %v2242_v3  ;;  %v1937_v0 = vpop.f32.mrf.mxu0 }
 0x35d   : > { %v5835_v7 = vadd.f32 %v4021_v54, %v1937_v0 }
 0x35e   : > { %v4186_v8 = vpop.f32.mrf.mxu0 }
 0x35f   : > { %v2245_v42 = vsel %vm2235_vm2, %v5835_v7, -inf }
 0x360   : > { %2246 = vmax.xlane.f32.xlu1 %v2245_v42 }
 0x370   : > { %v1978_v12 = vpop.f32.mrf.mxu1  ;;  %v2022_v14 = vpop.f32.mrf.mxu0 }
 0x371   : > { %v5843_v15 = vadd.f32 %v4021_v54, %v1978_v12  ;;  %v5853_v1 = vadd.f32 %v4021_v54, %v2022_v14 }
 0x372   : > { %v4193_v16 = vpop.f32.mrf.mxu1  ;;  %v4201_v19 = vpop.f32.mrf.mxu0 }
 0x373   : > { %v2248_v20 = vsel %vm2235_vm2, %v5843_v15, -inf  ;;  %v2254_v18 = vsel %vm2235_vm2, %v5853_v1, -inf  ;;  %v1117_v16 = vadd.f32 %v5839_v2, %v5813_v51  ;;  %v1109_v19 = vadd.f32 %v5841_v10, %v5813_v51 }
 0x374   : > { %v1981_v26 = vpop.f32.mrf.mxu1  ;;  %2249 = vmax.xlane.f32.xlu0 %v2248_v20  ;;  %v2025_v22 = vpop.f32.mrf.mxu0 }
 0x375   : > { %v5847_v25 = vadd.f32 %v4021_v54, %v1981_v26  ;;  %v5861_v38 = vadd.f32 %v4021_v54, %v2025_v22  ;;  %v4652_v20 = vpack.i.bf16 %v1117_v16, %v1109_v19 }
 0x376   : > { %v4194_v27 = vpop.f32.mrf.mxu1  ;;  %v4202_v31 = vpop.f32.mrf.mxu0 }
 0x377   : > { %v2251_v33 = vsel %vm2235_vm2, %v5847_v25, -inf  ;;  %v2257_v21 = vsel %vm2235_vm2, %v5861_v38, -inf }
 0x378   : > { %v2066_v35 = vpop.f32.mrf.mxu1  ;;  %2252 = vmax.xlane.f32.xlu1 %v2251_v33 }
 0x379   : > { %v5851_v37 = vadd.f32 %v4022_v29, %v2066_v35 }
 0x37a   : > { %v4209_v4 = vpop.f32.mrf.mxu1 }
 0x37b   : > { %v2260_v11 = vsel %vm2235_vm2, %v5851_v37, -inf }
 0x37c   : > { %v2069_v61 = vpop.f32.mrf.mxu1  ;;  %2261 = vmax.xlane.f32.xlu0 %v2260_v11 }
 0x37d   : > { %v5857_v63 = vadd.f32 %v4022_v29, %v2069_v61 }
 0x37e   : > { %v4210_v39 = vpop.f32.mrf.mxu1  ;;  %v2110_v40 = vpop.f32.mrf.mxu0 }
 0x37f   : > { %v2263_v43 = vsel %vm2235_vm2, %v5857_v63, -inf  ;;  %v5869_v36 = vadd.f32 %v4022_v29, %v2110_v40 }
 0x380   : > { %v2154_v45 = vpop.f32.mrf.mxu1  ;;  %2264 = vmax.xlane.f32.xlu1 %v2263_v43  ;;  %2255 = vmax.xlane.f32.xlu0 %v2254_v18  ;;  %v4217_v41 = vpop.f32.mrf.mxu0 }
 0x381   : > { %v5865_v47 = vadd.f32 %v4022_v29, %v2154_v45  ;;  %v2266_v50 = vsel %vm2235_vm2, %v5869_v36, -inf }
 0x382   : > { %v4225_v46 = vpop.f32.mrf.mxu1  ;;  %v2113_v48 = vpop.f32.mrf.mxu0 }
 0x383   : > { %v2272_v44 = vsel %vm2235_vm2, %v5865_v47, -inf  ;;  %v5877_v24 = vadd.f32 %v4022_v29, %v2113_v48 }
 0x384   : > { %v2157_v5 = vpop.f32.mrf.mxu1  ;;  %2273 = vmax.xlane.f32.xlu0 %v2272_v44  ;;  %2258 = vmax.xlane.f32.xlu1 %v2257_v21  ;;  %v4218_v13 = vpop.f32.mrf.mxu0 }
 0x385   : > { %v5873_v49 = vadd.f32 %v4022_v29, %v2157_v5  ;;  %v2269_v55 = vsel %vm2235_vm2, %v5877_v24, -inf }
 0x386   : > { %v4226_v52 = vpop.f32.mrf.mxu1 }
 0x387   : > { %v2275_v54 = vsel %vm2235_vm2, %v5873_v49, -inf }
 0x388   : > { %2276 = vmax.xlane.f32.xlu1 %v2275_v54  ;;  %2267 = vmax.xlane.f32.xlu0 %v2266_v50 }
 0x38c   : > { %2270 = vmax.xlane.f32.xlu1 %v2269_v55 }
 0x38e   : > { %v2198_v28 = vpop.f32.mrf.mxu0 }
 0x38f   : > { %v2233_v30 = vadd.f32 %v4022_v29, %v2198_v28 }
 0x390   : > { %v4233_v23 = vpop.f32.mrf.mxu0 }
 0x391   : > { %v2278_v32 = vsel %vm2235_vm2, %v2233_v30, -inf }
 0x392   : > { %2279 = vmax.xlane.f32.xlu0 %v2278_v32  ;;  %v2201_v57 = vpop.f32.mrf.mxu0 }
 0x393   : > { %v5884_v58 = vadd.f32 %v4022_v29, %v2201_v57 }
 0x394   : > { %v4234_v62 = vpop.f32.mrf.mxu0 }
 0x395   : > { %v2281_v3 = vsel %vm2235_vm2, %v5884_v58, -inf }
 0x396   : > { %2282 = vmax.xlane.f32.xlu1 %v2281_v3 }
 0x3dd   : > { %v2238_v0 = vpop.xlane.xlu0 %2237 }
 0x3de   : > { %v2284_v8 = vsub.f32 %v5823_v17, %v2238_v0 }
 0x3e0   : > { %v2300_v42 = vmul.f32 1.442695, %v2284_v8 }
 0x3e2   : > { %4966 = vpow2.f32 %v2300_v42 }
 0x3ef   : > { %v5889_v12 = vpop.eup %4966 }
 0x3f0   : > { %v2332_v14 = vsel %vm2235_vm2, %v5889_v12, 0.0 }
 0x3f1   : > { %2333 = vadd.xlane.f32.xlu0 %v2332_v14 }
 0x3fd   : > { %v5900_v17 = vpop.xlane.xlu0 %2249 }
 0x405   : > { %v5902_v26 = vpop.xlane.xlu0 %2261 }
 0x409   : > { %v5904_v22 = vpop.xlane.xlu0 %2255 }
 0x40d   : > { %v5906_v27 = vpop.xlane.xlu0 %2273 }
 0x411   : > { %v5908_v29 = vpop.xlane.xlu0 %2267 }
 0x41b   : > { %v2280_v2 = vpop.xlane.xlu0 %2279 }
 0x41c   : > { %v2298_v31 = vsub.f32 %v2233_v30, %v2280_v2 }
 0x41e   : > { %4651 = vxpose.xlu0.b32.start [1/2] (short) %v4650_v53, 128  ;;  %v2328_v33 = vmul.f32 1.442695, %v2298_v31 }
 0x420   : > { %4968 = vpow2.f32 %v2328_v33 }
 0x422   : > { %4653 = vxpose.xlu0.b32.end [2/2] (short) %v4652_v20, 128 }
 0x42d   : > { %v5910_v51 = vpop.eup %4968 }
 0x42e   : > { %v2374_v34 = vsel %vm2235_vm2, %v5910_v51, 0.0 }
 0x47a   : > { %v5914_v9 = vpop.xlane.xlu0 %2333 }
 0x487   : > { %2375 = vadd.xlane.f32.xlu0 %v2374_v34 }
 0x49a   : > { %v4654_v53 = vpop.trf.xlu0 }
 0x49b   : > { %v4655_v61 = vunpack.i.l.bf16 %v4654_v53 }
 0x49e   : > { %v4659_v10 = vpop.trf.xlu0 }
 0x49f   : > { %v4660_v43 = vunpack.i.l.bf16 %v4659_v10 }
 0x4a2   : > { %v4664_v35 = vpop.trf.xlu0 }
 0x4a3   : > { %v4665_v46 = vunpack.i.l.bf16 %v4664_v35 }
 0x4a6   : > { %v4669_v4 = vpop.trf.xlu0 }
 0x4a7   : > { %v4670_v13 = vunpack.i.l.bf16 %v4669_v4 }
 0x4aa   : > { %v4674_v11 = vpop.trf.xlu0 }
 0x4ab   : > { %v4675_v18 = vunpack.i.l.bf16 %v4674_v11 }
 0x4ad   : > { %v4734_v39 = vpack.i.bf16 %v4675_v18, %v4655_v61 }
 0x4ae   : > { %v4679_v40 = vpop.trf.xlu0 }
 0x4af   : > { %v4680_v45 = vunpack.i.l.bf16 %v4679_v40  ;;  %4735 = vxpose.xlu1.b32.start [1/4] (short) (narrow) %v4734_v39, 16 }
 0x4b1   : > { %v4736_v41 = vpack.i.bf16 %v4680_v45, %v4660_v43  ;;  %v4658_v45 = vunpack.i.h.bf16 %v4654_v53 }
 0x4b2   : > { %v4684_v21 = vpop.trf.xlu0 }
 0x4b3   : > { %v4685_v48 = vunpack.i.l.bf16 %v4684_v21  ;;  %4737 = vxpose.xlu1.b32.cont [2/4] (short) (narrow) %v4736_v41, 16  ;;  %v4663_v41 = vunpack.i.h.bf16 %v4659_v10 }
 0x4b5   : > { %v4738_v44 = vpack.i.bf16 %v4685_v48, %v4665_v46  ;;  %v4668_v46 = vunpack.i.h.bf16 %v4664_v35  ;;  %v4673_v48 = vunpack.i.h.bf16 %v4669_v4 }
 0x4b6   : > { %v4689_v5 = vpop.trf.xlu0 }
 0x4b7   : > { %v4690_v50 = vunpack.i.l.bf16 %v4689_v5  ;;  %4739 = vxpose.xlu1.b32.cont [3/4] (short) (narrow) %v4738_v44, 16  ;;  %v4678_v44 = vunpack.i.h.bf16 %v4674_v11 }
 0x4b9   : > { %v4740_v52 = vpack.i.bf16 %v4690_v50, %v4670_v13  ;;  %v4683_v13 = vunpack.i.h.bf16 %v4679_v40  ;;  %v4688_v50 = vunpack.i.h.bf16 %v4684_v21  ;;  %v2288_v21 = vsub.f32 %v5843_v15, %v5900_v17 }
 0x4ba   : > { %v4694_v54 = vpop.trf.xlu0 }
 0x4bb   : > { %4741 = vxpose.xlu1.b32.end [4/4] (short) (narrow) %v4740_v52, 16  ;;  %v4698_v55 = vunpack.i.h.bf16 %v4694_v54  ;;  %v4695_v8 = vunpack.i.l.bf16 %v4694_v54  ;;  %v4693_v52 = vunpack.i.h.bf16 %v4689_v5  ;;  %v2241_v54 = vpop.xlane.xlu1 %2240 }
 0x4bd   : > { %1764 = vxpose.xlu0.b32.start [1/4] (short) (narrow) %v4698_v55, 16 }
 0x4be   : > { %v4699_v28 = vpop.trf.xlu0 }
 0x4bf   : > { %v4703_v30 = vunpack.i.h.bf16 %v4699_v28  ;;  %v4700_v16 = vunpack.i.l.bf16 %v4699_v28  ;;  %v2244_v55 = vpop.xlane.xlu1 %2243  ;;  %v2285_v28 = vsub.f32 %v5827_v56, %v2241_v54  ;;  %v2294_v54 = vsub.f32 %v5869_v36, %v5908_v29 }
 0x4c0   : > { %v2286_v10 = vsub.f32 %v5831_v60, %v2244_v55  ;;  %v2292_v60 = vsub.f32 %v5851_v37, %v5902_v26 }
 0x4c1   : > { %1765 = vxpose.xlu0.b32.cont [2/4] (short) (narrow) %v4703_v30, 16  ;;  %v2302_v30 = vmul.f32 1.442695, %v2285_v28  ;;  %v2320_v28 = vmul.f32 1.442695, %v2294_v54 }
 0x4c2   : > { %v4704_v23 = vpop.trf.xlu0  ;;  %v2304_v4 = vmul.f32 1.442695, %v2286_v10 }
 0x4c3   : > { %v4708_v32 = vunpack.i.h.bf16 %v4704_v23  ;;  %v4705_v31 = vunpack.i.l.bf16 %v4704_v23  ;;  %v2247_v53 = vpop.xlane.xlu1 %2246  ;;  %4970 = vpow2.f32 %v2302_v30 }
 0x4c4   : > { %v2287_v11 = vsub.f32 %v5835_v7, %v2247_v53  ;;  %4972 = vpow2.f32 %v2304_v4  ;;  %v2316_v7 = vmul.f32 1.442695, %v2292_v60 }
 0x4c5   : > { %1766 = vxpose.xlu0.b32.cont [3/4] (short) (narrow) %v4708_v32, 16  ;;  %v2308_v32 = vmul.f32 1.442695, %v2288_v21 }
 0x4c6   : > { %v4709_v57 = vpop.trf.xlu0  ;;  %v2306_v40 = vmul.f32 1.442695, %v2287_v11 }
 0x4c7   : > { %v4713_v62 = vunpack.i.h.bf16 %v4709_v57  ;;  %v4710_v18 = vunpack.i.l.bf16 %v4709_v57  ;;  %v2253_v35 = vpop.xlane.xlu1 %2252 }
 0x4c8   : > { %4974 = vpow2.f32 %v2306_v40  ;;  %v2289_v56 = vsub.f32 %v5847_v25, %v2253_v35 }
 0x4c9   : > { %1767 = vxpose.xlu0.b32.end [4/4] (short) (narrow) %v4713_v62, 16  ;;  %4976 = vpow2.f32 %v2308_v32 }
 0x4ca   : > { %v5916_v3 = vpop.trf.xlu0  ;;  %v2310_v57 = vmul.f32 1.442695, %v2289_v56 }
 0x4cb   : > { %v4715_v0 = vunpack.i.l.bf16 %v5916_v3  ;;  %v2265_v23 = vpop.xlane.xlu1 %2264 }
 0x4cc   : > { %4978 = vpow2.f32 %v2310_v57 }
 0x4cd   : > { %v4752_v42 = vpack.i.bf16 %v4715_v0, %v4695_v8  ;;  %v2293_v8 = vsub.f32 %v5857_v63, %v2265_v23  ;;  %4980 = vpow2.f32 %v2316_v7 }
 0x4ce   : > { %v5919_v14 = vpop.trf.xlu0 }
 0x4cf   : > { %v4720_v19 = vunpack.i.l.bf16 %v5919_v14  ;;  %4753 = vxpose.xlu1.b32.start [1/4] (short) (narrow) %v4752_v42, 16  ;;  %v2259_v5 = vpop.xlane.xlu1 %2258  ;;  %v2318_v25 = vmul.f32 1.442695, %v2293_v8 }
 0x4d0   : > { %v5936_v0 = vpop.eup %4970 }
 0x4d1   : > { %v4754_v20 = vpack.i.bf16 %v4720_v19, %v4700_v16  ;;  %v2335_v15 = vsel %vm2235_vm2, %v5936_v0, 0.0  ;;  %v5941_v17 = vpop.eup %4972  ;;  %v2290_v16 = vsub.f32 %v5853_v1, %v5904_v22  ;;  %4982 = vpow2.f32 %v2318_v25 }
 0x4d2   : > { %v5922_v2 = vpop.trf.xlu0  ;;  %v2338_v37 = vsel %vm2235_vm2, %v5941_v17, 0.0  ;;  %v2291_v22 = vsub.f32 %v5861_v38, %v2259_v5 }
 0x4d3   : > { %v4725_v33 = vunpack.i.l.bf16 %v5922_v2  ;;  %4755 = vxpose.xlu1.b32.cont [2/4] (short) (narrow) %v4754_v20, 16  ;;  %v2277_v62 = vpop.xlane.xlu1 %2276  ;;  %v2312_v63 = vmul.f32 1.442695, %v2290_v16  ;;  %v2296_v20 = vsub.f32 %v5865_v47, %v5906_v27 }
 0x4d5   : > { %v4756_v34 = vpack.i.bf16 %v4725_v33, %v4705_v31  ;;  %v5947_v26 = vpop.eup %4974  ;;  %4984 = vpow2.f32 %v2312_v63  ;;  %v2324_v1 = vmul.f32 1.442695, %v2296_v20  ;;  %v4718_v63 = vunpack.i.h.bf16 %v5916_v3 }
 0x4d6   : > { %v5925_v61 = vpop.trf.xlu0  ;;  %v2341_v31 = vsel %vm2235_vm2, %v5947_v26, 0.0  ;;  %v5953_v33 = vpop.eup %4976  ;;  %v4723_v20 = vunpack.i.h.bf16 %v5919_v14 }
 0x4d7   : > { %v4730_v39 = vunpack.i.l.bf16 %v5925_v61  ;;  %4757 = vxpose.xlu1.b32.cont [3/4] (short) (narrow) %v4756_v34, 16  ;;  %v2271_v42 = vpop.xlane.xlu1 %2270  ;;  %4986 = vpow2.f32 %v2324_v1 }
 0x4d8   : > { %v2295_v53 = vsub.f32 %v5877_v24, %v2271_v42 }
 0x4d9   : > { %v4758_v43 = vpack.i.bf16 %v4730_v39, %v4710_v18  ;;  %v2344_v18 = vsel %vm2235_vm2, %v5953_v33, 0.0  ;;  %v5958_v39 = vpop.eup %4978 }
 0x4da   : > { %v2322_v36 = vmul.f32 1.442695, %v2295_v53 }
 0x4db   : > { %4759 = vxpose.xlu1.b32.end [4/4] (short) (narrow) %v4758_v43, 16  ;;  %v2283_v19 = vpop.xlane.xlu1 %2282 }
 0x4dc   : > { %v2299_v29 = vsub.f32 %v5884_v58, %v2283_v19 }
 0x4de   : > { %v2330_v11 = vmul.f32 1.442695, %v2299_v29 }
 0x4df   : > { %1700 = vxpose.xlu1.b32.start [1/4] (short) (narrow) %v4658_v45, 16 }
 0x4e3   : > { %1701 = vxpose.xlu1.b32.cont [2/4] (short) (narrow) %v4663_v41, 16 }
 0x4e7   : > { %1702 = vxpose.xlu1.b32.cont [3/4] (short) (narrow) %v4668_v46, 16  ;;  %v2314_v46 = vmul.f32 1.442695, %v2291_v22 }
 0x4e9   : > { %4988 = vpow2.f32 %v2314_v46 }
 0x4eb   : > { %1703 = vxpose.xlu1.b32.end [4/4] (short) (narrow) %v4673_v48, 16  ;;  %v2297_v48 = vsub.f32 %v5873_v49, %v2277_v62 }
 0x4ef   : > { %1732 = vxpose.xlu1.b32.start [1/4] (short) (narrow) %v4678_v44, 16  ;;  %v2347_v44 = vsel %vm2235_vm2, %v5958_v39, 0.0 }
 0x4f3   : > { %1733 = vxpose.xlu1.b32.cont [2/4] (short) (narrow) %v4683_v13, 16  ;;  %v5963_v13 = vpop.eup %4980 }
 0x4f4   : > { %v2356_v55 = vsel %vm2235_vm2, %v5963_v13, 0.0  ;;  %v5971_v49 = vpop.eup %4982 }
 0x4f5   : > { %v2359_v30 = vsel %vm2235_vm2, %v5971_v49, 0.0  ;;  %v5976_v10 = vpop.eup %4984 }
 0x4f6   : > { %v2350_v35 = vsel %vm2235_vm2, %v5976_v10, 0.0  ;;  %v5981_v4 = vpop.eup %4986 }
 0x4f7   : > { %1734 = vxpose.xlu1.b32.cont [3/4] (short) (narrow) %v4688_v50, 16  ;;  %v2368_v24 = vsel %vm2235_vm2, %v5981_v4, 0.0  ;;  %v5985_v23 = vpop.eup %4988 }
 0x4f8   : > { %v2353_v40 = vsel %vm2235_vm2, %v5985_v23, 0.0 }
 0x4fb   : > { %1735 = vxpose.xlu1.b32.end [4/4] (short) (narrow) %v4693_v52, 16  ;;  %v2326_v52 = vmul.f32 1.442695, %v2297_v48 }
 0x4fd   : > { %4990 = vpow2.f32 %v2326_v52 }
 0x4fe   : > { %4992 = vpow2.f32 %v2320_v28 }
 0x4ff   : > { %4994 = vpow2.f32 %v2322_v36 }
 0x500   : > { %4996 = vpow2.f32 %v2330_v11 }
 0x501   : > { %4998 = vrcp.f32 %v5914_v9 }
 0x50a   : > { %v5989_v21 = vpop.eup %4990 }
 0x50b   : > { %v2371_v58 = vsel %vm2235_vm2, %v5989_v21, 0.0  ;;  %v5993_v5 = vpop.eup %4992 }
 0x50c   : > { %v2362_v56 = vsel %vm2235_vm2, %v5993_v5, 0.0  ;;  %v5997_v57 = vpop.eup %4994 }
 0x50d   : > { %v2365_v42 = vsel %vm2235_vm2, %v5997_v57, 0.0  ;;  %v6001_v25 = vpop.eup %4996 }
 0x50e   : > { %v2377_v19 = vsel %vm2235_vm2, %v6001_v25, 0.0 }
 0x510   : > { %v2376_v54 = vpop.xlane.xlu0 %2375 }
 0x522   : > { %2336 = vadd.xlane.f32.xlu1 %v2335_v15 }
 0x526   : > { %2339 = vadd.xlane.f32.xlu1 %v2338_v37 }
 0x52a   : > { %2342 = vadd.xlane.f32.xlu1 %v2341_v31  ;;  %v4728_v31 = vunpack.i.h.bf16 %v5922_v2 }
 0x52b   : > { %v4742_v34 = vpop.trf.xlu1 }
 0x52c   : > { %v4746_v43 = vunpack.i.h.bf16 %v4742_v34  ;;  %v4743_v45 = vunpack.i.l.bf16 %v4742_v34  ;;  %v4733_v34 = vunpack.i.h.bf16 %v5925_v61 }
 0x52e   : > { %2345 = vadd.xlane.f32.xlu1 %v2344_v18 }
 0x52f   : > { %v4747_v47 = vpop.trf.xlu1 }
 0x530   : > { %v4751_v27 = vunpack.i.h.bf16 %v4747_v47  ;;  %v4748_v41 = vunpack.i.l.bf16 %v4747_v47  ;;  %v4999_v47 = vpop.eup %4998 }
 0x531   : > { %v2396_v61 = vmul.f32 %v4999_v47, %v5889_v12 }
 0x532   : > { %2348 = vadd.xlane.f32.xlu1 %v2347_v44  ;;  %v2420_v38 = vpack.c.bf16 %v4748_v41, %v4743_v45  ;;  %v2421_v50 = vpack.c.bf16 %v4751_v27, %v4746_v43 }
 0x534   : > { %4236 = vmatpush3.bf16.msra.mxu1 %v2420_v38  ;;  %4242 = vmatpush3.bf16.msra.mxu0 %v2421_v50 }
 0x535   : > { %4247 = vmatprep.subr.bf16.mxu1 %v5304_v59  ;;  %4253 = vmatprep.subr.bf16.mxu0 %v5304_v59 }
 0x536   : > { %2357 = vadd.xlane.f32.xlu1 %v2356_v55 }
 0x53a   : > { %2360 = vadd.xlane.f32.xlu1 %v2359_v30 }
 0x53e   : > { %2351 = vadd.xlane.f32.xlu1 %v2350_v35 }
 0x542   : > { %2369 = vadd.xlane.f32.xlu1 %v2368_v24 }
 0x546   : > { %2354 = vadd.xlane.f32.xlu1 %v2353_v40 }
 0x54a   : > { %2372 = vadd.xlane.f32.xlu1 %v2371_v58 }
 0x54b   : > { %v4760_v32 = vpop.trf.xlu1 }
 0x54c   : > { %v4764_v60 = vunpack.i.h.bf16 %v4760_v32  ;;  %v4761_v62 = vunpack.i.l.bf16 %v4760_v32 }
 0x54e   : > { %2363 = vadd.xlane.f32.xlu1 %v2362_v56 }
 0x54f   : > { %v4765_v7 = vpop.trf.xlu1 }
 0x550   : > { %v4769_v8 = vunpack.i.h.bf16 %v4765_v7  ;;  %v4766_v15 = vunpack.i.l.bf16 %v4765_v7 }
 0x552   : > { %2366 = vadd.xlane.f32.xlu1 %v2365_v42  ;;  %v2422_v16 = vpack.c.bf16 %v4766_v15, %v4761_v62  ;;  %v2423_v37 = vpack.c.bf16 %v4769_v8, %v4764_v60 }
 0x556   : > { %2378 = vadd.xlane.f32.xlu1 %v2377_v19 }
 0x55b   : > { %v1716_v1 = vpop.trf.xlu1 }
 0x55f   : > { %v1717_v22 = vpop.trf.xlu1 }
 0x560   : > { %v2424_v35 = vpack.c.bf16 %v1717_v22, %v1716_v1 }
 0x56b   : > { %v6009_v18 = vpop.trf.xlu1 }
 0x56f   : > { %v6011_v43 = vpop.trf.xlu1 }
 0x570   : > { %v2425_v19 = vpack.c.bf16 %v6011_v43, %v6009_v18 }
 0x589   : > { %1796 = vxpose.xlu1.b32.start [1/4] (short) (narrow) %v4718_v63, 16 }
 0x58d   : > { %1797 = vxpose.xlu1.b32.cont [2/4] (short) (narrow) %v4723_v20, 16 }
 0x591   : > { %1798 = vxpose.xlu1.b32.cont [3/4] (short) (narrow) %v4728_v31, 16 }
 0x595   : > { %1799 = vxpose.xlu1.b32.end [4/4] (short) (narrow) %v4733_v34, 16 }
 0x5ab   : > { %v2337_v45 = vpop.xlane.xlu1 %2336 }
 0x5ac   : > { %5000 = vrcp.f32 %v2337_v45 }
 0x5af   : > { %v2340_v3 = vpop.xlane.xlu1 %2339 }
 0x5b0   : > { %5002 = vrcp.f32 %v2340_v3 }
 0x5b3   : > { %v2343_v14 = vpop.xlane.xlu1 %2342 }
 0x5b4   : > { %5004 = vrcp.f32 %v2343_v14 }
 0x5b7   : > { %v2346_v2 = vpop.xlane.xlu1 %2345 }
 0x5b8   : > { %5006 = vrcp.f32 %v2346_v2 }
 0x5b9   : > { %v5001_v27 = vpop.eup %5000 }
 0x5ba   : > { %v2397_v41 = vmul.f32 %v5001_v27, %v5936_v0 }
 0x5bb   : > { %v2349_v46 = vpop.xlane.xlu1 %2348 }
 0x5bc   : > { %5008 = vrcp.f32 %v2349_v46  ;;  %v2412_v48 = vpack.c.bf16 %v2397_v41, %v2396_v61 }
 0x5bd   : > { %v5003_v9 = vpop.eup %5002 }
 0x5be   : > { %4238 = vmatmul.mubr.msk.bf16.vlgmr.msra.gmra.mxu1 %vm2235_vm2, %v2412_v48  ;;  %v2398_v50 = vmul.f32 %v5003_v9, %v5941_v17 }
 0x5bf   : > { %4248 = vmatpush3.bf16.msra.mxu1 %v2422_v16  ;;  %v2358_v44 = vpop.xlane.xlu1 %2357  ;;  %4249 = vmatprep.mubr.msk.bf16.mxu1 %vm5305_vm0, %v5304_v59 }
 0x5c0   : > { %4259 = vmatprep.subr.bf16.mxu1 %v5304_v59  ;;  %5010 = vrcp.f32 %v2358_v44 }
 0x5c1   : > { %v5005_v38 = vpop.eup %5004 }
 0x5c2   : > { %v2399_v12 = vmul.f32 %v5005_v38, %v5947_v26  ;;  %v1780_v26 = vpop.trf.xlu0 }
 0x5c3   : > { %v2361_v0 = vpop.xlane.xlu1 %2360 }
 0x5c4   : > { %5012 = vrcp.f32 %v2361_v0  ;;  %v2413_v52 = vpack.c.bf16 %v2399_v12, %v2398_v50 }
 0x5c5   : > { %v5007_v55 = vpop.eup %5006 }
 0x5c6   : > { %4244 = vmatmul.mubr.msk.bf16.vlgmr.msra.gmra.mxu0 %vm2235_vm2, %v2413_v52  ;;  %v2400_v30 = vmul.f32 %v5007_v55, %v5953_v33  ;;  %v1781_v40 = vpop.trf.xlu0 }
 0x5c7   : > { %4254 = vmatpush3.bf16.msra.mxu0 %v2423_v37  ;;  %v2352_v28 = vpop.xlane.xlu1 %2351  ;;  %4255 = vmatprep.mubr.msk.bf16.mxu0 %vm5305_vm0, %v5304_v59  ;;  %v2426_v56 = vpack.c.bf16 %v1781_v40, %v1780_v26 }
 0x5c8   : > { %4265 = vmatprep.subr.bf16.mxu0 %v5304_v59  ;;  %5014 = vrcp.f32 %v2352_v28 }
 0x5c9   : > { %v5009_v53 = vpop.eup %5008 }
 0x5ca   : > { %v2401_v17 = vmul.f32 %v5009_v53, %v5958_v39 }
 0x5cb   : > { %v2370_v36 = vpop.xlane.xlu1 %2369 }
 0x5cc   : > { %v2414_v29 = vpack.c.bf16 %v2401_v17, %v2400_v30 }
 0x5cd   : > { %v5011_v11 = vpop.eup %5010 }
 0x5ce   : > { %4250 = vmatmul.mubr.msk.bf16.vlgmr.msra.gmra.mxu1 %vm2235_vm2, %v2414_v29  ;;  %v2404_v39 = vmul.f32 %v5011_v11, %v5963_v13 }
 0x5cf   : > { %4260 = vmatpush3.bf16.msra.mxu1 %v2424_v35  ;;  %v2355_v24 = vpop.xlane.xlu1 %2354  ;;  %4261 = vmatprep.mubr.msk.bf16.mxu1 %vm5305_vm0, %v5304_v59 }
 0x5d0   : > { %5016 = vrcp.f32 %v2355_v24  ;;  %4271 = vmatprep.subr.bf16.mxu1 %v5304_v59 }
 0x5d1   : > { %v5013_v33 = vpop.eup %5012  ;;  %5018 = vrcp.f32 %v2370_v36 }
 0x5d2   : > { %v2405_v58 = vmul.f32 %v5013_v33, %v5971_v49 }
 0x5d3   : > { %v2373_v32 = vpop.xlane.xlu1 %2372 }
 0x5d4   : > { %5020 = vrcp.f32 %v2373_v32  ;;  %v2416_v60 = vpack.c.bf16 %v2405_v58, %v2404_v39 }
 0x5d5   : > { %v5015_v7 = vpop.eup %5014 }
 0x5d6   : > { %4262 = vmatmul.mubr.msk.bf16.vlgmr.msra.gmra.mxu1 %vm2235_vm2, %v2416_v60  ;;  %v2402_v13 = vmul.f32 %v5015_v7, %v5976_v10 }
 0x5d7   : > { %v2364_v62 = vpop.xlane.xlu1 %2363  ;;  %4272 = vmatpush3.bf16.msra.mxu1 %v2426_v56  ;;  %4273 = vmatprep.mubr.msk.bf16.mxu1 %vm5305_vm0, %v5304_v59 }
 0x5d8   : > { %5022 = vrcp.f32 %v2364_v62 }
 0x5db   : > { %v2367_v8 = vpop.xlane.xlu1 %2366 }
 0x5dc   : > { %5024 = vrcp.f32 %v2367_v8 }
 0x5dd   : > { %v5017_v15 = vpop.eup %5016 }
 0x5de   : > { %v2403_v49 = vmul.f32 %v5017_v15, %v5985_v23  ;;  %v5019_v42 = vpop.eup %5018 }
 0x5df   : > { %v2408_v63 = vmul.f32 %v5019_v42, %v5981_v4  ;;  %v2379_v4 = vpop.xlane.xlu1 %2378  ;;  %v4944_v42 = vld [vmem:[%s5568_s16 + $0x28] sm:$0xff]  }
 0x5e0   : > { %v2415_v16 = vpack.c.bf16 %v2403_v49, %v2402_v13  ;;  %5026 = vrcp.f32 %v2379_v4  ;;  %v4942_v13 = vld [vmem:[%s5568_s16 + $0x38] sm:$0xff]   ;;  %v4943_v49 = vld [vmem:[%s5568_s16 + $0x30] sm:$0xff]  }
 0x5e1   : > { %v5021_v37 = vpop.eup %5020  ;;  %5028 = vrcp.f32 %v2376_v54  ;;  %4283 = vmatprep.subr.bf16.mxu1 %v4942_v13 }
 0x5e2   : > { %4256 = vmatmul.mubr.msk.bf16.vlgmr.msra.gmra.mxu0 %vm2235_vm2, %v2415_v16  ;;  %v2409_v20 = vmul.f32 %v5021_v37, %v5989_v21  ;;  %v4945_v16 = vld [vmem:[%s5568_s16 + $0x20] sm:$0xff]   ;;  %v4946_v37 = vld [vmem:[%s5568_s16 + $0x18] sm:$0xff]  }
 0x5e3   : > { %4266 = vmatpush3.bf16.msra.mxu0 %v2425_v19  ;;  %4267 = vmatprep.mubr.msk.bf16.mxu0 %vm5305_vm0, %v5304_v59  ;;  %v4947_v19 = vld [vmem:[%s5568_s16 + $0x10] sm:$0xff]  }
 0x5e4   : > { %v2418_v31 = vpack.c.bf16 %v2409_v20, %v2408_v63  ;;  %4277 = vmatprep.subr.bf16.mxu0 %v5304_v59 }
 0x5e5   : > { %v5023_v10 = vpop.eup %5022 }
 0x5e6   : > { %4274 = vmatmul.mubr.msk.bf16.vlgmr.msra.gmra.mxu1 %vm2235_vm2, %v2418_v31  ;;  %v2406_v34 = vmul.f32 %v5023_v10, %v5993_v5  ;;  %v4948_v10 = vld [vmem:[%s5568_s16 + $0x8] sm:$0xff]  }
 0x5e7   : > { %4284 = vmatpush3.bf16.msra.mxu1 %v4942_v13 }
 0x5e8   : > { %4285 = vmatprep.subr.bf16.mxu1 %v4943_v49 }
 0x5e9   : > { %v5025_v23 = vpop.eup %5024 }
 0x5ea   : > { %v2407_v1 = vmul.f32 %v5025_v23, %v5997_v57 }
 0x5eb   : > { %4286 = vmatpush3.bf16.msra.mxu1 %v4943_v49 }
 0x5ec   : > { %v2417_v22 = vpack.c.bf16 %v2407_v1, %v2406_v34  ;;  %4287 = vmatprep.subr.bf16.mxu1 %v4944_v42  ;;  %v4949_v34 = vld [vmem:[%s5568_s16] sm:$0xff]  }
 0x5ed   : > { %v5027_v18 = vpop.eup %5026  ;;  %v3222_v1 = vld [vmem:[%s6265_s2] sm:$0xff] }
 0x5ee   : > { %4268 = vmatmul.mubr.msk.bf16.vlgmr.msra.gmra.mxu0 %vm2235_vm2, %v2417_v22  ;;  %v5029_v43 = vpop.eup %5028  ;;  %v2411_v3 = vmul.f32 %v5027_v18, %v6001_v25  ;;  %v3223_v22 = vld [vmem:[%s6265_s2 + $0x8] sm:$0xff] }
 0x5ef   : > { %4279 = vmatprep.mubr.msk.bf16.mxu0 %vm5305_vm0, %v5304_v59  ;;  %v2410_v5 = vmul.f32 %v5029_v43, %v5910_v51  ;;  %4288 = vmatpush3.bf16.msra.mxu1 %v4944_v42  ;;  %v3225_v43 = vld [vmem:[%s6265_s2 + $0x18] sm:$0xff] }
 0x5f0   : > { %4289 = vmatprep.subr.bf16.mxu1 %v4945_v16 }
 0x5f1   : > { %v2419_v57 = vpack.c.bf16 %v2411_v3, %v2410_v5 }
 0x5f3   : > { %4290 = vmatpush3.bf16.msra.mxu1 %v4945_v16 }
 0x5f4   : > { %4291 = vmatprep.subr.bf16.mxu1 %v4946_v37 }
 0x5f7   : > { %4292 = vmatpush3.bf16.msra.mxu1 %v4946_v37 }
 0x5f8   : > { %4293 = vmatprep.subr.bf16.mxu1 %v4947_v19 }
 0x5fb   : > { %4294 = vmatpush3.bf16.msra.mxu1 %v4947_v19 }
 0x5fc   : > { %4295 = vmatprep.subr.bf16.mxu1 %v4948_v10 }
 0x5ff   : > { %4296 = vmatpush3.bf16.msra.mxu1 %v4948_v10 }
 0x600   : > { %4297 = vmatprep.subr.bf16.mxu1 %v4949_v34 }
 0x603   : > { %4298 = vmatpush3.bf16.msra.mxu1 %v4949_v34 }
 0x605   : > { %v1812_v21 = vpop.trf.xlu1 }
 0x609   : > { %v1813_v45 = vpop.trf.xlu1 }
 0x60a   : > { %v2427_v14 = vpack.c.bf16 %v1813_v45, %v1812_v21  ;;  %v3224_v21 = vld [vmem:[%s6265_s2 + $0x10] sm:$0xff] }
 0x60c   : > { %4278 = vmatpush3.bf16.msra.mxu0 %v2427_v14 }
 0x60f   : > { %4280 = vmatmul.mubr.msk.bf16.vlgmr.msra.gmra.mxu0 %vm2235_vm2, %v2419_v57 }
 0x67e   : > { %v2465_v47 = vpop.f32.mrf.mxu1 }
 0x680   : > { %v4239_v2 = vpop.f32.mrf.mxu1 }
 0x682   : > { %v2468_v27 = vpop.f32.mrf.mxu1 }
 0x684   : > { %v4240_v59 = vpop.f32.mrf.mxu1 }
 0x686   : > { %v2509_v61 = vpop.f32.mrf.mxu0 }
 0x688   : > { %v4245_v41 = vpop.f32.mrf.mxu0 }
 0x68a   : > { %v2512_v46 = vpop.f32.mrf.mxu0 }
 0x68c   : > { %v4246_v48 = vpop.f32.mrf.mxu0 }
 0x68e   : > { %v2553_v9 = vpop.f32.mrf.mxu1 }
 0x690   : > { %v4251_v44 = vpop.f32.mrf.mxu1 }
 0x692   : > { %v2556_v38 = vpop.f32.mrf.mxu1 }
 0x694   : > { %v4252_v50 = vpop.f32.mrf.mxu1 }
 0x696   : > { %v2641_v25 = vpop.f32.mrf.mxu1 }
 0x697   : > { %v4770_v12 = vpack.i.bf16 %v2641_v25, %v2465_v47 }
 0x698   : > { %v4263_v0 = vpop.f32.mrf.mxu1 }
 0x699   : > { %4771 = vxpose.xlu1.b32.start [1/2] (short) (narrow) %v4770_v12, 32 }
 0x69a   : > { %v2644_v51 = vpop.f32.mrf.mxu1 }
 0x69b   : > { %v4772_v52 = vpack.i.bf16 %v2644_v51, %v2468_v27 }
 0x69c   : > { %v4264_v54 = vpop.f32.mrf.mxu1 }
 0x69d   : > { %4773 = vxpose.xlu1.b32.end [2/2] (short) (narrow) %v4772_v52, 32  ;;  %v4031_v52 = vld [vmem:[%s6266_s19] ss:$0 sm:$0xff] }
 0x6a2   : > { %v2597_v55 = vpop.f32.mrf.mxu0 }
 0x6a4   : > { %v4257_v28 = vpop.f32.mrf.mxu0 }
 0x6a6   : > { %v2600_v53 = vpop.f32.mrf.mxu0  ;;  %v2729_v30 = vpop.f32.mrf.mxu1 }
 0x6a7   : > { %v4818_v58 = vpack.i.bf16 %v2729_v30, %v2553_v9 }
 0x6a8   : > { %v4258_v17 = vpop.f32.mrf.mxu0  ;;  %v4275_v26 = vpop.f32.mrf.mxu1 }
 0x6aa   : > { %v2732_v36 = vpop.f32.mrf.mxu1 }
 0x6ab   : > { %v4820_v32 = vpack.i.bf16 %v2732_v36, %v2556_v38 }
 0x6ac   : > { %v4276_v29 = vpop.f32.mrf.mxu1 }
 0x6ae   : > { %v2685_v35 = vpop.f32.mrf.mxu0 }
 0x6af   : > { %v4794_v11 = vpack.i.bf16 %v2685_v35, %v2509_v61  ;;  %v5062_v35 = vld [vmem:[#allocation2 + $0x10] sm:$0xff] }
 0x6b0   : > { %v4269_v24 = vpop.f32.mrf.mxu0 }
 0x6b1   : > { %4795 = vxpose.xlu1.b32.start [1/2] (short) (narrow) %v4794_v11, 32 }
 0x6b2   : > { %v2688_v40 = vpop.f32.mrf.mxu0 }
 0x6b3   : > { %v4796_v33 = vpack.i.bf16 %v2688_v40, %v2512_v46 }
 0x6b4   : > { %v4270_v39 = vpop.f32.mrf.mxu0 }
 0x6b5   : > { %4797 = vxpose.xlu1.b32.end [2/2] (short) (narrow) %v4796_v33, 32  ;;  %v5063_v33 = vld [vmem:[#allocation2 + $0x18] sm:$0xff] }
 0x6be   : > { %4819 = vxpose.xlu1.b32.start [1/2] (short) (narrow) %v4818_v58, 32 }
 0x6c2   : > { %4821 = vxpose.xlu1.b32.end [2/2] (short) (narrow) %v4820_v32, 32  ;;  %v5064_v32 = vld [vmem:[#allocation2] sm:$0xff] }
 0x6cf   : > { %v2773_v56 = vpop.f32.mrf.mxu0 }
 0x6d0   : > { %v4842_v60 = vpack.i.bf16 %v2773_v56, %v2597_v55 }
 0x6d1   : > { %v4281_v62 = vpop.f32.mrf.mxu0 }
 0x6d2   : > { %4843 = vxpose.xlu0.b32.start [1/2] (short) (narrow) %v4842_v60, 32  ;;  %v5065_v60 = vld [vmem:[#allocation2 + $0x8] sm:$0xff] }
 0x6d3   : > { %v2776_v7 = vpop.f32.mrf.mxu0 }
 0x6d4   : > { %v4844_v8 = vpack.i.bf16 %v2776_v7, %v2600_v53 }
 0x6d5   : > { %v4282_v15 = vpop.f32.mrf.mxu0 }
 0x6d6   : > { %4845 = vxpose.xlu0.b32.end [2/2] (short) (narrow) %v4844_v8, 32 }
 0x6e0   : > { %4908 = vset.pattern.permute.xlu1 %v5303_v6 }
 0x6e8   : > { %3228 = vperm.xlu1 %4908, %v3222_v1  }
 0x6ec   : > { %3233 = vperm.xlu1 %4908, %v3223_v22   ;;  %v4950_v22 = vld [vmem:[%s5570_s13 + $0x38] sm:$0xff]  }
 0x6ed   : > { %4303 = vmatprep.subr.bf16.mxu0 %v4950_v22 }
 0x6ee   : > { %4304 = vmatpush3.bf16.msra.mxu0 %v4950_v22 }
 0x6f0   : > { %3238 = vperm.xlu1 %4908, %v3224_v21   ;;  %v4952_v21 = vld [vmem:[%s5570_s13 + $0x28] sm:$0xff]  }
 0x6f4   : > { %3243 = vperm.xlu1 %4908, %v3225_v43   ;;  %v4954_v43 = vld [vmem:[%s5570_s13 + $0x18] sm:$0xff]  }
 0x715   : > { %v4774_v63 = vpop.trf.xlu1 }
 0x716   : > { %4867 = vxpose.xlu0.b32.start [1/16] (narrow) %v4774_v63, 16 }
 0x719   : > { %v4779_v20 = vpop.trf.xlu1 }
 0x71a   : > { %4869 = vxpose.xlu0.b32.cont [2/16] (narrow) %v4779_v20, 16 }
 0x71d   : > { %v4784_v31 = vpop.trf.xlu1 }
 0x71e   : > { %4871 = vxpose.xlu0.b32.cont [3/16] (narrow) %v4784_v31, 16 }
 0x721   : > { %v4789_v23 = vpop.trf.xlu1 }
 0x722   : > { %4873 = vxpose.xlu0.b32.cont [4/16] (narrow) %v4789_v23, 16 }
 0x72d   : > { %v4798_v4 = vpop.trf.xlu1 }
 0x72e   : > { %4875 = vxpose.xlu0.b32.cont [5/16] (narrow) %v4798_v4, 16  ;;  %v4951_v4 = vld [vmem:[%s5570_s13 + $0x30] sm:$0xff]  }
 0x72f   : > { %4305 = vmatprep.subr.bf16.mxu0 %v4951_v4 }
 0x730   : > { %4306 = vmatpush3.bf16.msra.mxu0 %v4951_v4 }
 0x731   : > { %v4803_v18 = vpop.trf.xlu1  ;;  %4307 = vmatprep.subr.bf16.mxu0 %v4952_v21 }
 0x732   : > { %4877 = vxpose.xlu0.b32.cont [6/16] (narrow) %v4803_v18, 16  ;;  %v4953_v18 = vld [vmem:[%s5570_s13 + $0x20] sm:$0xff]  }
 0x734   : > { %4308 = vmatpush3.bf16.msra.mxu0 %v4952_v21  ;;  %v4963_v21 = vld [vmem:[%s5614_s20 + $0x10] sm:$0xff]  }
 0x735   : > { %v4808_v45 = vpop.trf.xlu1  ;;  %4309 = vmatprep.subr.bf16.mxu0 %v4953_v18 }
 0x736   : > { %4879 = vxpose.xlu0.b32.cont [7/16] (narrow) %v4808_v45, 16  ;;  %v4955_v45 = vld [vmem:[%s5570_s13 + $0x10] sm:$0xff]  }
 0x738   : > { %4310 = vmatpush3.bf16.msra.mxu0 %v4953_v18  ;;  %v4964_v18 = vld [vmem:[%s5614_s20 + $0x8] sm:$0xff]  }
 0x739   : > { %v4813_v3 = vpop.trf.xlu1  ;;  %4311 = vmatprep.subr.bf16.mxu0 %v4954_v43 }
 0x73a   : > { %4881 = vxpose.xlu0.b32.cont [8/16] (narrow) %v4813_v3, 16  ;;  %v4956_v3 = vld [vmem:[%s5570_s13 + $0x8] sm:$0xff]  }
 0x73c   : > { %4312 = vmatpush3.bf16.msra.mxu0 %v4954_v43 }
 0x73d   : > { %v4822_v14 = vpop.trf.xlu1  ;;  %4313 = vmatprep.subr.bf16.mxu0 %v4955_v45 }
 0x73e   : > { %4883 = vxpose.xlu0.b32.cont [9/16] (narrow) %v4822_v14, 16  ;;  %v4957_v14 = vld [vmem:[%s5570_s13] sm:$0xff]  }
 0x740   : > { %4314 = vmatpush3.bf16.msra.mxu0 %v4955_v45 }
 0x741   : > { %v4827_v5 = vpop.trf.xlu1  ;;  %4315 = vmatprep.subr.bf16.mxu0 %v4956_v3 }
 0x742   : > { %4885 = vxpose.xlu0.b32.cont [10/16] (narrow) %v4827_v5, 16  ;;  %v4958_v5 = vld [vmem:[%s5614_s20 + $0x38] sm:$0xff]  }
 0x743   : > { %4323 = vmatprep.subr.bf16.mxu1 %v4958_v5 }
 0x744   : > { %4316 = vmatpush3.bf16.msra.mxu0 %v4956_v3  ;;  %v4042_v3 = vld [vmem:[%s6267_s30] ss:$0 sm:$0xff] }
 0x745   : > { %v4832_v57 = vpop.trf.xlu1  ;;  %4317 = vmatprep.subr.bf16.mxu0 %v4957_v14 }
 0x746   : > { %4887 = vxpose.xlu0.b32.cont [11/16] (narrow) %v4832_v57, 16  ;;  %v4959_v57 = vld [vmem:[%s5614_s20 + $0x30] sm:$0xff]  }
 0x748   : > { %4318 = vmatpush3.bf16.msra.mxu0 %v4957_v14 }
 0x749   : > { %v4837_v47 = vpop.trf.xlu1 }
 0x74a   : > { %4889 = vxpose.xlu0.b32.cont [12/16] (narrow) %v4837_v47, 16  ;;  %v4960_v47 = vld [vmem:[%s5614_s20 + $0x28] sm:$0xff]  }
 0x74e   : > { %v4846_v2 = vpop.trf.xlu0 }
 0x74f   : > { %4891 = vxpose.xlu0.b32.cont [13/16] (narrow) %v4846_v2, 16  ;;  %v4961_v2 = vld [vmem:[%s5614_s20 + $0x20] sm:$0xff]  }
 0x752   : > { %v4851_v27 = vpop.trf.xlu0 }
 0x753   : > { %4893 = vxpose.xlu0.b32.cont [14/16] (narrow) %v4851_v27, 16  ;;  %v4962_v27 = vld [vmem:[%s5614_s20 + $0x18] sm:$0xff]  }
 0x756   : > { %v4856_v59 = vpop.trf.xlu0 }
 0x757   : > { %4895 = vxpose.xlu0.b32.cont [15/16] (narrow) %v4856_v59, 16 }
 0x75a   : > { %v4861_v61 = vpop.trf.xlu0 }
 0x75b   : > { %4897 = vxpose.xlu0.b32.end [16/16] (narrow) %v4861_v61, 16 }
 0x763   : > { %v3229_v12 = vpop.permute.xlu1 %3228 }
 0x767   : > { %v3234_v0 = vpop.permute.xlu1 %3233 }
 0x76b   : > { %v3239_v28 = vpop.permute.xlu1 %3238 }
 0x76f   : > { %v3244_v40 = vpop.permute.xlu1 %3243 }
 0x784   : > { %4909 = vset.pattern.permute.xlu0 %v5303_v6 }
 0x79b   : > { %v4898_v41 = vpop.trf.xlu0 }
 0x79c   : > { %v4902_v46 = vunpack.i.h.bf16 %v4898_v41  ;;  %v4899_v48 = vunpack.i.l.bf16 %v4898_v41 }
 0x79f   : > { %v4903_v9 = vpop.trf.xlu0 }
 0x7a0   : > { %v4907_v44 = vunpack.i.h.bf16 %v4903_v9  ;;  %v4904_v38 = vunpack.i.l.bf16 %v4903_v9 }
 0x7a2   : > { %v3100_v50 = vpack.c.bf16 %v4904_v38, %v4899_v48  ;;  %v3101_v25 = vpack.c.bf16 %v4907_v44, %v4902_v46 }
 0x7a4   : > { %4299 = vmatprep.mubr.bf16.mxu1 %v3100_v50 }
 0x7a5   : > { %4300 = vmatmul.mubr.bf16.vlgmr.msra.gmra.mxu1 %v3101_v25 }
 0x7a6   : > { %4324 = vmatpush3.bf16.msra.mxu1 %v4958_v5 }
 0x7a7   : > { %4325 = vmatprep.subr.bf16.mxu1 %v4959_v57 }
 0x7aa   : > { %4326 = vmatpush3.bf16.msra.mxu1 %v4959_v57 }
 0x7ab   : > { %4327 = vmatprep.subr.bf16.mxu1 %v4960_v47 }
 0x7ae   : > { %4328 = vmatpush3.bf16.msra.mxu1 %v4960_v47 }
 0x7af   : > { %4329 = vmatprep.subr.bf16.mxu1 %v4961_v2 }
 0x7b2   : > { %4330 = vmatpush3.bf16.msra.mxu1 %v4961_v2 }
 0x7b3   : > { %4331 = vmatprep.subr.bf16.mxu1 %v4962_v27 }
 0x7b6   : > { %4332 = vmatpush3.bf16.msra.mxu1 %v4962_v27 }
 0x7b7   : > { %4333 = vmatprep.subr.bf16.mxu1 %v4963_v21 }
 0x7ba   : > { %4334 = vmatpush3.bf16.msra.mxu1 %v4963_v21 }
 0x7bb   : > { %4335 = vmatprep.subr.bf16.mxu1 %v4964_v18 }
 0x7be   : > { %4336 = vmatpush3.bf16.msra.mxu1 %v4964_v18 }
 0x865   : > { %v4301_v51 = vpop.f32.mrf.mxu1 }
 0x866   : > { %v3216_v6 = vadd.f32 %v4301_v51, %v4031_v52 }
 0x867   : > { %v3207_v54 = vpop.f32.mrf.mxu1 }
 0x868   : > { %v3208_v55 = vadd.f32 %v4031_v52, %v3207_v54  ;;  %v3248_v26 = vmul.f32 %v3239_v28, %v3216_v6 }
 0x869   : > { %v4302_v53 = vpop.f32.mrf.mxu1 }
 0x86a   : > { %v3246_v30 = vmul.f32 %v3229_v12, %v3208_v55  ;;  %v3219_v36 = vadd.f32 %v4302_v53, %v4031_v52  ;;  %v3252_v39 = vadd.f32 %v5063_v33, %v3248_v26 }
 0x86b   : > { %v3210_v17 = vpop.f32.mrf.mxu1 }
 0x86c   : > { %v3211_v29 = vadd.f32 %v4031_v52, %v3210_v17  ;;  %v3250_v11 = vadd.f32 %v5062_v35, %v3246_v30  ;;  %v3249_v58 = vmul.f32 %v3244_v40, %v3219_v36 }
 0x86e   : > { %v3247_v24 = vmul.f32 %v3234_v0, %v3211_v29  ;;  %3256 = vadd.xlane.f32.xlu1 %v3250_v11  ;;  %v3253_v62 = vadd.f32 %v5065_v60, %v3249_v58 }
 0x870   : > { %v3251_v56 = vadd.f32 %v5064_v32, %v3247_v24 }
 0x872   : > { %3258 = vadd.xlane.f32.xlu0 %v3251_v56  ;;  %3260 = vadd.xlane.f32.xlu1 %v3252_v39 }
 0x876   : > { %3262 = vadd.xlane.f32.xlu1 %v3253_v62 }
 0x8f7   : > { %v3257_v7 = vpop.xlane.xlu1 %3256 }
 0x8f8   : > { %v3265_v15 = vmul.f32 0.0078125, %v3257_v7 }
 0x8fa   : > { %v6085_v16 = vsub.f32 %v3250_v11, %v3265_v15 }
 0x8fb   : > { %v3261_v8 = vpop.xlane.xlu1 %3260  ;;  %v3259_v49 = vpop.xlane.xlu0 %3258 }
 0x8fc   : > { %v3267_v13 = vmul.f32 0.0078125, %v3261_v8  ;;  %v3266_v37 = vmul.f32 0.0078125, %v3259_v49  ;;  %v3273_v10 = vmul.f32 %v6085_v16, %v6085_v16 }
 0x8fe   : > { %v6083_v42 = vsub.f32 %v3252_v39, %v3267_v13  ;;  %v6089_v20 = vsub.f32 %v3251_v56, %v3266_v37  ;;  %v4040_v56 = vld [vmem:[%s811_s9] ss:$0 sm:$0xff] }
 0x8ff   : > { %v3263_v63 = vpop.xlane.xlu1 %3262 }
 0x900   : > { %v3275_v19 = vmul.f32 %v6083_v42, %v6083_v42  ;;  %v3268_v31 = vmul.f32 0.0078125, %v3263_v63  ;;  %v3274_v34 = vmul.f32 %v6089_v20, %v6089_v20  ;;  %v3296_v8 = vmul.f32 %v4040_v56, %v6089_v20 }
 0x901   : > { %v3297_v49 = vmul.f32 %v4040_v56, %v6083_v42 }
 0x902   : > { %3281 = vadd.xlane.f32.xlu1 %v3275_v19  ;;  %v6093_v23 = vsub.f32 %v3253_v62, %v3268_v31  ;;  %v3295_v62 = vmul.f32 %v4040_v56, %v6085_v16  ;;  %v4041_v19 = vld [vmem:[%s814_s3] ss:$0 sm:$0xff] }
 0x904   : > { %v3276_v1 = vmul.f32 %v6093_v23, %v6093_v23  ;;  %v3298_v63 = vmul.f32 %v4040_v56, %v6093_v23  ;;  %v4965_v23 = vld [vmem:[%s5614_s20] sm:$0xff]  }
 0x905   : > { %4337 = vmatprep.subr.bf16.mxu1 %v4965_v23 }
 0x906   : > { %3277 = vadd.xlane.f32.xlu1 %v3273_v10  ;;  %4338 = vmatpush3.bf16.msra.mxu1 %v4965_v23 }
 0x90a   : > { %3279 = vadd.xlane.f32.xlu1 %v3274_v34 }
 0x90e   : > { %3283 = vadd.xlane.f32.xlu1 %v3276_v1 }
 0x98b   : > { %v3282_v59 = vpop.xlane.xlu1 %3281 }
 0x98c   : > { %v3287_v61 = vmul.f32 0.007874016, %v3282_v59 }
 0x98e   : > { %5030 = vrsqrt.f32 %v3287_v61  ;;  %vm3315_vm3 = vcmp.eq.f32.partialorder %v3287_v61, inf  ;;  %v3318_v51 = vand.u32 2147483648, %v3287_v61  ;;  %vm3317_vm4 = vcmp.eq.f32.partialorder %v3287_v61, 0.0 }
 0x98f   : > { %v3278_v41 = vpop.xlane.xlu1 %3277 }
 0x990   : > { %v3285_v46 = vmul.f32 0.007874016, %v3278_v41 }
 0x992   : > { %5032 = vrsqrt.f32 %v3285_v46  ;;  %vm3301_vm5 = vcmp.eq.f32.partialorder %v3285_v46, inf  ;;  %v3304_v54 = vand.u32 2147483648, %v3285_v46  ;;  %vm3303_vm6 = vcmp.eq.f32.partialorder %v3285_v46, 0.0 }
 0x993   : > { %v3280_v48 = vpop.xlane.xlu1 %3279 }
 0x994   : > { %v3286_v9 = vmul.f32 0.007874016, %v3280_v48 }
 0x996   : > { %5034 = vrsqrt.f32 %v3286_v9  ;;  %vm3308_vm7 = vcmp.eq.f32.partialorder %v3286_v9, inf  ;;  %v3311_v36 = vand.u32 2147483648, %v3286_v9  ;;  %vm3310_vm8 = vcmp.eq.f32.partialorder %v3286_v9, 0.0 }
 0x997   : > { %v3284_v44 = vpop.xlane.xlu1 %3283 }
 0x998   : > { %v3288_v38 = vmul.f32 0.007874016, %v3284_v44 }
 0x99a   : > { %5036 = vrsqrt.f32 %v3288_v38  ;;  %vm3322_vm9 = vcmp.eq.f32.partialorder %v3288_v38, inf  ;;  %v3325_v33 = vand.u32 2147483648, %v3288_v38  ;;  %vm3324_vm10 = vcmp.eq.f32.partialorder %v3288_v38, 0.0 }
 0x99b   : > { %v5031_v50 = vpop.eup %5030 }
 0x99c   : > { %v3314_v25 = vmul.f32 %v5031_v50, %v3287_v61 }
 0x99e   : > { %v3316_v0 = vsel %vm3315_vm3, %v3287_v61, %v3314_v25 }
 0x99f   : > { %v5033_v12 = vpop.eup %5032  ;;  %v3319_v6 = vsel %vm3317_vm4, %v3318_v51, %v3316_v0 }
 0x9a0   : > { %v3300_v52 = vmul.f32 %v5033_v12, %v3285_v46  ;;  %v3329_v26 = vadd.f32 1e-06, %v3319_v6 }
 0x9a2   : > { %v3302_v55 = vsel %vm3301_vm5, %v3285_v46, %v3300_v52 }
 0x9a3   : > { %v5035_v28 = vpop.eup %5034  ;;  %v3305_v53 = vsel %vm3303_vm6, %v3304_v54, %v3302_v55 }
 0x9a4   : > { %v3327_v30 = vadd.f32 1e-06, %v3305_v53  ;;  %v3307_v17 = vmul.f32 %v5035_v28, %v3286_v9 }
 0x9a6   : > { %5038 = vrcp.f32 %v3327_v30  ;;  %v3309_v29 = vsel %vm3308_vm7, %v3286_v9, %v3307_v17 }
 0x9a7   : > { %v5037_v35 = vpop.eup %5036  ;;  %v3312_v11 = vsel %vm3310_vm8, %v3311_v36, %v3309_v29  ;;  %5040 = vrcp.f32 %v3329_v26 }
 0x9a8   : > { %v3328_v24 = vadd.f32 1e-06, %v3312_v11  ;;  %v3321_v40 = vmul.f32 %v5037_v35, %v3288_v38 }
 0x9aa   : > { %5042 = vrcp.f32 %v3328_v24  ;;  %v3323_v39 = vsel %vm3322_vm9, %v3288_v38, %v3321_v40  ;;  %v4051_v38 = vld [vmem:[%s6268_s17] ss:$0 sm:$0xff] }
 0x9ab   : > { %v3326_v58 = vsel %vm3324_vm10, %v3325_v33, %v3323_v39 }
 0x9ac   : > { %v3330_v32 = vadd.f32 1e-06, %v3326_v58 }
 0x9ae   : > { %5044 = vrcp.f32 %v3330_v32 }
 0x9b3   : > { %v5039_v60 = vpop.eup %5038 }
 0x9b4   : > { %v5041_v7 = vpop.eup %5040  ;;  %v3332_v15 = vmul.f32 %v5039_v60, %v3295_v62 }
 0x9b5   : > { %v3336_v16 = vmul.f32 %v5041_v7, %v3297_v49 }
 0x9b6   : > { %v3345_v31 = vadd.f32 %v4041_v19, %v3332_v15 }
 0x9b7   : > { %v5043_v13 = vpop.eup %5042  ;;  %v3347_v22 = vadd.f32 %v4041_v19, %v3336_v16 }
 0x9b8   : > { %v3334_v37 = vmul.f32 %v5043_v13, %v3296_v8 }
 0x9ba   : > { %v3346_v10 = vadd.f32 %v4041_v19, %v3334_v37 }
 0x9bb   : > { %v5045_v34 = vpop.eup %5044 }
 0x9bc   : > { %v3349_v20 = vpack.c.bf16 %v3346_v10, %v3345_v31  ;;  %v3338_v1 = vmul.f32 %v5045_v34, %v3298_v63 }
 0x9be   : > { %4319 = vmatprep.mubr.bf16.mxu0 %v3349_v20  ;;  %v3348_v42 = vadd.f32 %v4041_v19, %v3338_v1 }
 0x9c0   : > { %v3350_v4 = vpack.c.bf16 %v3348_v42, %v3347_v22 }
 0x9c2   : > { %4320 = vmatmul.mubr.bf16.vlgmr.msra.gmra.mxu0 %v3350_v4 }
 0xa82   : > { %v4321_v43 = vpop.f32.mrf.mxu0 }
 0xa83   : > { %v3465_v47 = vadd.f32 %v4321_v43, %v4042_v3 }
 0xa84   : > { %v3456_v45 = vpop.f32.mrf.mxu0 }
 0xa85   : > { %v3457_v5 = vadd.f32 %v4042_v3, %v3456_v45  ;;  %v3473_v46 = vmax.f32 %v3465_v47, 0.0 }
 0xa86   : > { %v4322_v14 = vpop.f32.mrf.mxu0 }
 0xa87   : > { %v3468_v57 = vadd.f32 %v4322_v14, %v4042_v3  ;;  %v3471_v61 = vmax.f32 %v3457_v5, 0.0 }
 0xa88   : > { %v3459_v2 = vpop.f32.mrf.mxu0 }
 0xa89   : > { %v3460_v27 = vadd.f32 %v4042_v3, %v3459_v2  ;;  %v3474_v59 = vmax.f32 %v3468_v57, 0.0 }
 0xa8b   : > { %v3472_v41 = vmax.f32 %v3460_v27, 0.0  ;;  %v3476_v9 = vpack.c.bf16 %v3474_v59, %v3473_v46  ;;  %v4060_v46 = vld [vmem:[%s817_s24] ss:$0 sm:$0xff] }
 0xa8d   : > { %v3475_v48 = vpack.c.bf16 %v3472_v41, %v3471_v61 }
 0xa8f   : > { %4339 = vmatprep.mubr.bf16.mxu1 %v3475_v48 }
 0xa90   : > { %4340 = vmatmul.mubr.bf16.vlgmr.msra.gmra.mxu1 %v3476_v9 }
 0xb50   : > { %v4341_v44 = vpop.f32.mrf.mxu1 }
 0xb51   : > { %v3591_v0 = vadd.f32 %v4341_v44, %v4051_v38  ;;  %v4061_v44 = vld [vmem:[%s820_s0] ss:$0 sm:$0xff] }
 0xb52   : > { %v3582_v50 = vpop.f32.mrf.mxu1 }
 0xb53   : > { %v3583_v25 = vadd.f32 %v4051_v38, %v3582_v50  ;;  %v3599_v6 = vadd.f32 %v3591_v0, %v3347_v22 }
 0xb54   : > { %v4342_v12 = vpop.f32.mrf.mxu1 }
 0xb55   : > { %v3597_v51 = vadd.f32 %v3583_v25, %v3345_v31  ;;  %v3594_v55 = vadd.f32 %v4342_v12, %v4051_v38 }
 0xb56   : > { %v3585_v52 = vpop.f32.mrf.mxu1 }
 0xb57   : > { %v3586_v54 = vadd.f32 %v4051_v38, %v3585_v52  ;;  %3603 = vadd.xlane.f32.xlu1 %v3597_v51  ;;  %v3600_v53 = vadd.f32 %v3594_v55, %v3348_v42 }
 0xb59   : > { %v3598_v28 = vadd.f32 %v3586_v54, %v3346_v10 }
 0xb5b   : > { %3605 = vadd.xlane.f32.xlu0 %v3598_v28  ;;  %3607 = vadd.xlane.f32.xlu1 %v3599_v6 }
 0xb5f   : > { %3609 = vadd.xlane.f32.xlu0 %v3600_v53 }
 0xbe0   : > { %v3604_v30 = vpop.xlane.xlu1 %3603 }
 0xbe1   : > { %v3611_v17 = vmul.f32 0.0078125, %v3604_v30 }
 0xbe3   : > { %v6139_v26 = vsub.f32 %v3597_v51, %v3611_v17 }
 0xbe4   : > { %v3606_v36 = vpop.xlane.xlu0 %3605  ;;  %v3608_v29 = vpop.xlane.xlu1 %3607 }
 0xbe5   : > { %v3612_v35 = vmul.f32 0.0078125, %v3606_v36  ;;  %v3613_v11 = vmul.f32 0.0078125, %v3608_v29  ;;  %v3619_v24 = vmul.f32 %v6139_v26, %v6139_v26  ;;  %v3641_v48 = vmul.f32 %v4060_v46, %v6139_v26 }
 0xbe7   : > { %v6143_v40 = vsub.f32 %v3598_v28, %v3612_v35  ;;  %v6145_v33 = vsub.f32 %v3599_v6, %v3613_v11  ;;  %3623 = vadd.xlane.f32.xlu1 %v3619_v24 }
 0xbe8   : > { %v3610_v39 = vpop.xlane.xlu0 %3609 }
 0xbe9   : > { %v3614_v58 = vmul.f32 0.0078125, %v3610_v39  ;;  %v3620_v32 = vmul.f32 %v6143_v40, %v6143_v40  ;;  %v3621_v56 = vmul.f32 %v6145_v33, %v6145_v33  ;;  %v3642_v50 = vmul.f32 %v4060_v46, %v6143_v40 }
 0xbea   : > { %v3643_v0 = vmul.f32 %v4060_v46, %v6145_v33 }
 0xbeb   : > { %v6151_v60 = vsub.f32 %v3600_v53, %v3614_v58  ;;  %3625 = vadd.xlane.f32.xlu0 %v3620_v32  ;;  %3627 = vadd.xlane.f32.xlu1 %v3621_v56 }
 0xbed   : > { %v3622_v62 = vmul.f32 %v6151_v60, %v6151_v60  ;;  %v3644_v6 = vmul.f32 %v4060_v46, %v6151_v60 }
 0xbef   : > { %3629 = vadd.xlane.f32.xlu0 %v3622_v62 }
 0xc70   : > { %v3624_v7 = vpop.xlane.xlu1 %3623 }
 0xc71   : > { %v3631_v8 = vmul.f32 0.007874016, %v3624_v7 }
 0xc73   : > { %5046 = vrsqrt.f32 %v3631_v8  ;;  %vm3647_vm11 = vcmp.eq.f32.partialorder %v3631_v8, inf  ;;  %v3650_v16 = vand.u32 2147483648, %v3631_v8  ;;  %vm3649_vm12 = vcmp.eq.f32.partialorder %v3631_v8, 0.0 }
 0xc74   : > { %v3626_v15 = vpop.xlane.xlu0 %3625  ;;  %v3628_v49 = vpop.xlane.xlu1 %3627 }
 0xc75   : > { %v3632_v13 = vmul.f32 0.007874016, %v3626_v15  ;;  %v3633_v37 = vmul.f32 0.007874016, %v3628_v49 }
 0xc77   : > { %5048 = vrsqrt.f32 %v3632_v13  ;;  %vm3654_vm13 = vcmp.eq.f32.partialorder %v3632_v13, inf  ;;  %vm3656_vm14 = vcmp.eq.f32.partialorder %v3632_v13, 0.0  ;;  %v3657_v21 = vand.u32 2147483648, %v3632_v13 }
 0xc78   : > { %5050 = vrsqrt.f32 %v3633_v37  ;;  %v3630_v19 = vpop.xlane.xlu0 %3629  ;;  %vm3661_vm15 = vcmp.eq.f32.partialorder %v3633_v37, inf  ;;  %v3664_v43 = vand.u32 2147483648, %v3633_v37  ;;  %vm3663_vm0 = vcmp.eq.f32.partialorder %v3633_v37, 0.0 }
 0xc79   : > { %v3634_v63 = vmul.f32 0.007874016, %v3630_v19 }
 0xc7b   : > { %5052 = vrsqrt.f32 %v3634_v63  ;;  %vm3668_vm1 = vcmp.eq.f32.partialorder %v3634_v63, inf  ;;  %v3671_v27 = vand.u32 2147483648, %v3634_v63  ;;  %vm3670_vm2 = vcmp.eq.f32.partialorder %v3634_v63, 0.0 }
 0xc80   : > { %v5047_v31 = vpop.eup %5046 }
 0xc81   : > { %v3646_v10 = vmul.f32 %v5047_v31, %v3631_v8 }
 0xc83   : > { %v3648_v34 = vsel %vm3647_vm11, %v3631_v8, %v3646_v10 }
 0xc84   : > { %v5049_v20 = vpop.eup %5048  ;;  %v3651_v1 = vsel %vm3649_vm12, %v3650_v16, %v3648_v34 }
 0xc85   : > { %v5051_v22 = vpop.eup %5050  ;;  %v3673_v42 = vadd.f32 1e-06, %v3651_v1  ;;  %v3653_v4 = vmul.f32 %v5049_v20, %v3632_v13 }
 0xc86   : > { %v3660_v18 = vmul.f32 %v5051_v22, %v3633_v37 }
 0xc87   : > { %5054 = vrcp.f32 %v3673_v42  ;;  %v3655_v23 = vsel %vm3654_vm13, %v3632_v13, %v3653_v4 }
 0xc88   : > { %v5053_v45 = vpop.eup %5052  ;;  %v3658_v3 = vsel %vm3656_vm14, %v3657_v21, %v3655_v23  ;;  %v3662_v14 = vsel %vm3661_vm15, %v3633_v37, %v3660_v18 }
 0xc89   : > { %v3674_v5 = vadd.f32 1e-06, %v3658_v3  ;;  %v3665_v57 = vsel %vm3663_vm0, %v3664_v43, %v3662_v14  ;;  %v3667_v47 = vmul.f32 %v5053_v45, %v3634_v63 }
 0xc8a   : > { %v3675_v2 = vadd.f32 1e-06, %v3665_v57 }
 0xc8b   : > { %5056 = vrcp.f32 %v3674_v5  ;;  %v3669_v59 = vsel %vm3668_vm1, %v3634_v63, %v3667_v47 }
 0xc8c   : > { %5058 = vrcp.f32 %v3675_v2  ;;  %v3672_v61 = vsel %vm3670_vm2, %v3671_v27, %v3669_v59 }
 0xc8d   : > { %v3676_v41 = vadd.f32 1e-06, %v3672_v61 }
 0xc8f   : > { %5060 = vrcp.f32 %v3676_v41 }
 0xc94   : > { %v5055_v9 = vpop.eup %5054 }
 0xc95   : > { %v3678_v38 = vmul.f32 %v5055_v9, %v3641_v48 }
 0xc97   : > { %v3691_v25 = vadd.f32 %v4061_v44, %v3678_v38 }
 0xc98   : > { %v5057_v12 = vpop.eup %5056 }
 0xc99   : > { %v5059_v51 = vpop.eup %5058  ;;  %v3680_v52 = vmul.f32 %v5057_v12, %v3642_v50 }
 0xc9a   : > { %v3682_v54 = vmul.f32 %v5059_v51, %v3643_v0 }
 0xc9b   : > { %v3692_v55 = vadd.f32 %v4061_v44, %v3680_v52  ;;  %3698 = sbr.rel (%p4062_p11) target bundleno = 3234 (0xca2), region = 108 }
 0xc9c   : > { %v5061_v28 = vpop.eup %5060  ;;  %v3693_v53 = vadd.f32 %v4061_v44, %v3682_v54 }
 0xc9d   : > { %v3684_v30 = vmul.f32 %v5061_v28, %v3644_v6 }
 0xc9f   : > { %v3694_v17 = vadd.f32 %v4061_v44, %v3684_v30 }
 0xca0   : > { %3699 = vst [vmem:[#allocation2 + $0x10] sm:$0xff] %v3691_v25  ;;  %3700 = vst [vmem:[#allocation2] sm:$0xff] %v3692_v55 }
 0xca1   : > { %3701 = vst [vmem:[#allocation2 + $0x18] sm:$0xff] %v3693_v53  ;;  %3702 = vst [vmem:[#allocation2 + $0x8] sm:$0xff] %v3694_v17 }
 0xca2 PF: > { %p4063_p0 = scmp.ne.s32.totalorder %s5282_s21, 1 }
 0xca4   : > { %3706 = sbr.rel (%p4063_p0) target bundleno = 3243 (0xcab), region = 112 }
 0xca9   : > { %3707 = vst [vmem:[#allocation12] sm:$0xff] %v3691_v25  ;;  %3708 = vst [vmem:[#allocation12 + $0x8] sm:$0xff] %v3692_v55 }
 0xcaa   : > { %3709 = vst [vmem:[#allocation12 + $0x10] sm:$0xff] %v3693_v53  ;;  %3710 = vst [vmem:[#allocation12 + $0x18] sm:$0xff] %v3694_v17 }
 0xcab PF: > { %s6271_s7 = sld [smem:[#allocation23_spill]]  ;;  %s5306_s24 = smov [#allocation12]  }
 0xcac   : > { %s3721_s0 = sshll.u32 %s5306_s24, 4  ;;  %s3722_s0 = int_to_ptr.vmem [resolvable:$true] %s3721_s0 }
 0xcad   : > { %s5204_s5 = scalar_lea.vmem %s3722_s0, 512  ;;  %p5211_p2 = scmp.lt.s32.totalorder %s3722_s0, %s3722_s0 }
 0xcae   : > { %p5205_p12 = scmp.ne.s32.totalorder %s3722_s0, %s5204_s5  ;;  %p5212_p4 = scmp.lt.s32.totalorder %s5204_s5, %s5204_s5 }
 0xcb0   : > { %p5213_p5 = por %p5212_p4, %p5211_p2 }
 0xcb1   : > { %p4383_p1 = scmp.eq.s32.totalorder %s6271_s7, 1 }
 0xcb3   : > { %p5206_p13 = pnand %p5205_p12, %p4383_p1 }
 0xcb5   : > { %p5207_p3 = pneg %p5206_p13 }
 0xcb7   : > { %p5214_p8 = pnand %p5213_p5, %p5207_p3 }
 0xcb9   : > { %5217 = shalt.err (!%p5214_p8)
}
 0xcba   : > { %s5307_s21 = smov 128   ;;  %s5308_s29 = smov 8  }
 0xcbb   : > { %s6272_s15 = sld [smem:[#allocation33_spill]] }
 0xcc1   : > { %4360 = dma.vmem_to_hbm [thread:$0]  (%p4383_p1), %s3722_s0, 512, %s6272_s15, [#allocation5], %s5307_s21, %s5307_s21, %s5308_s29  }
 0xcc2   : > { %5265 = dma.done.wait (%p4383_p1), [#allocation5], 512  }
 0xcc3   : > { %5267 = vsyncadd (%p4383_p1), [#allocation5], 4294966784 }
 0xcc4 PF: > { %s6273_s14 = sld [smem:[#allocation20_spill]] }
 0xcc5   : > { %s6274_s18 = sld [smem:[#allocation17_spill]] }
 0xcc6   : > { %s6275_s19 = sld [smem:[#allocation18_spill]] }
 0xcc7   : > { %s6276_s20 = sld [smem:[#allocation22_spill]] }
 0xcc8   : > { %s6277_s21 = sld [smem:[#allocation19_spill]] }
 0xcc9   : > { %s6278_s22 = sld [smem:[#allocation21_spill]] }
 0xcca   : > { %s33_s23 = sadd.s32 1, %s6273_s14  }
 0xccb   : > { %p30_p9 = scmp.ge.s32.totalorder %s33_s23, 4  }
 0xccd   :  { %32 = sbr.rel (!%p30_p9) target bundleno = 19 (0x13), region = 201 }
 0xcd2   :  { %3737 = vsyncpa [#allocation4], 1 }
 0xcd3   :  { %3739 = vsyncpa [#allocation4 + $0x1], 1 }
 0xcd4   :  { %3740 = vsyncpa [#allocation7], 1 }
 0xcd5   :  { %3742 = vsyncpa [#allocation7 + $0x1], 1 }
 0xcd6   :  { %3743 = vsyncpa [#allocation10], 1 }
 0xcd7   :  { %3745 = vsyncpa [#allocation10 + $0x1], 1 }
 0xcd8   :  { %3746 = vsyncpa [#allocation5], 1 }
 0xcd9   :  { %3748 = vsyncpa [#allocation5 + $0x1], 1 }

</bundles_post_ra>
